<compile_context>
chip_gen: v5e
topology: v5e:2x2
jax: 0.10.0
libtpu: 0.0.40
codegen_flags: <defaults>
</compile_context>

<pallas_src>
import numpy as np
import jax
import jax.numpy as jnp
from jax.experimental import pallas as pl
from jax.experimental.pallas import tpu as pltpu

_BN_EPS = 1e-5
_VMEM_LIMIT_CACHE = [None]


def _vmem_limit_bytes():
    """Generation-aware scoped-VMEM limit (~70% of physical, with fallback)."""
    if _VMEM_LIMIT_CACHE[0] is None:
        try:
            cap = int(pltpu.get_tpu_info().vmem_capacity_bytes)
        except Exception:
            cap = 64 * 1024 * 1024
        _VMEM_LIMIT_CACHE[0] = max(32 * 1024 * 1024,
                                   min(int(cap * 0.7), 112 * 1024 * 1024))
    return _VMEM_LIMIT_CACHE[0]


def _round_up(a, m):
    return ((a + m - 1) // m) * m


def _largest_divisor_leq(n, cap):
    cap = max(1, min(n, cap))
    for d in range(cap, 0, -1):
        if n % d == 0:
            return d
    return 1


# --------------------------- Pallas kernels ---------------------------------
def _conv3x3_core(xin_f32, w_ref, y_ref, sums_ref, xp_ref, acc_ref):
    """Shared 3x3 conv (pad = -1) + streaming BN statistics.

    xin_f32:  (H, W, Cin) f32 value to convolve (already pre-activated).
    w_ref:    (3, 3*Cin, Cout) bf16, indexed [dy, dx*Cin + c, o].
    y_ref:    (1, H, W, Cout) bf16 output block.
    sums_ref: (1, 2, Cout) f32 per-core accumulator (sum, sum of squares).
    xp_ref:   (H+3, WP, Cin) f32 scratch, WP = round_up(W+2, 8).  Row 0 / H+1
              are -1 pads, row H+2 is shift slack; col 0 and cols W+1.. are -1
              pads / slack.  Borders are filled once per core and persist.
    acc_ref:  (H*WP, Cout) f32 accumulator scratch (padded-width conv output).
    """
    hp3, wp, cin = xp_ref.shape
    h = hp3 - 3
    w, cout = y_ref.shape[2], y_ref.shape[3]

    @pl.when(pl.program_id(1) == 0)
    def _init():
        xp_ref[...] = jnp.full(xp_ref.shape, -1.0, xp_ref.dtype)
        sums_ref[...] = jnp.zeros_like(sums_ref)

    # Place the image interior; the -1 border/slack persists from _init.
    xp_ref[1:h + 1, 1:w + 1, :] = xin_f32

    # Flatten row-major (WP is a sublane multiple -> layout-preserving merge)
    # and build the dx-grouped slab XCAT[r, dx*Cin + c] = flat[r + dx, c].
    l = (h + 2) * wp
    xflat = xp_ref[...].astype(jnp.bfloat16).reshape(hp3 * wp, cin)
    xcat = jnp.concatenate(
        [xflat[0:l, :], xflat[1:l + 1, :], xflat[2:l + 2, :]], axis=-1)

    # 3 dy-grouped MXU dots with K = 3*Cin; the LHS slices start at sublane-
    # aligned offsets (dy * WP) and accumulate directly into the scratch.
    for dy in range(3):
        part = jnp.dot(xcat[dy * wp:(dy + h) * wp, :], w_ref[dy],
                       preferred_element_type=jnp.float32)
        if dy == 0:
            acc_ref[...] = part
        else:
            acc_ref[...] += part

    # Compact the padded width once; emit bf16 y and f32 statistics.
    yv = acc_ref[...].reshape(h, wp, cout)[:, 0:w, :]
    y_ref[0] = yv.astype(y_ref.dtype)
    yf = yv.reshape(h * w, cout)
    s0 = jnp.sum(yf, axis=0, keepdims=True)
    s1 = jnp.sum(yf * yf, axis=0, keepdims=True)
    sums_ref[0] += jnp.concatenate([s0, s1], axis=0)


def _conv1_kernel(x_ref, w_ref, y_ref, sums_ref, xp_ref, acc_ref):
    _conv3x3_core(x_ref[0].astype(jnp.float32), w_ref, y_ref, sums_ref,
                  xp_ref, acc_ref)


def _conv2_kernel(y1_ref, aff_ref, w_ref, y_ref, sums_ref, xp_ref, acc_ref):
    # Fused BN1-apply (+beta1) + ReLU: h1 never round-trips through HBM.
    c = y1_ref.shape[3]
    scale = aff_ref[0:1, :].reshape(1, 1, c)
    shift = aff_ref[1:2, :].reshape(1, 1, c)
    h1 = jnp.maximum(y1_ref[0].astype(jnp.float32) * scale + shift, 0.0)
    _conv3x3_core(h1, w_ref, y_ref, sums_ref, xp_ref, acc_ref)


def _bn_res_relu_kernel(y_ref, aff_ref, res_ref, o_ref):
    c = y_ref.shape[3]
    scale = aff_ref[0:1, :].reshape(1, 1, c)
    shift = aff_ref[1:2, :].reshape(1, 1, c)
    out = y_ref[0].astype(jnp.float32) * scale + shift + res_ref[0]
    o_ref[0] = jnp.maximum(out, 0.0).astype(o_ref.dtype)


# --------------------------- pallas_call wrappers ----------------------------
def _conv_call(kernel, n, h, w, cin, cout, extra_in_specs, ncores):
    npc = n // ncores
    wp = _round_up(w + 2, 8)
    img_spec = pl.BlockSpec((1, h, w, cin), lambda c, i: (c * npc + i, 0, 0, 0))
    w_spec = pl.BlockSpec((3, 3 * cin, cout), lambda c, i: (0, 0, 0))
    y_spec = pl.BlockSpec((1, h, w, cout), lambda c, i: (c * npc + i, 0, 0, 0))
    sums_spec = pl.BlockSpec((1, 2, cout), lambda c, i: (c, 0, 0))
    return pl.pallas_call(
        kernel,
        grid=(ncores, npc),
        in_specs=[img_spec] + extra_in_specs + [w_spec],
        out_specs=(y_spec, sums_spec),
        out_shape=(jax.ShapeDtypeStruct((n, h, w, cout), jnp.bfloat16),
                   jax.ShapeDtypeStruct((ncores, 2, cout), jnp.float32)),
        scratch_shapes=[pltpu.VMEM((h + 3, wp, cin), jnp.float32),
                        pltpu.VMEM((h * wp, cout), jnp.float32)],
        compiler_params=pltpu.CompilerParams(
            dimension_semantics=("parallel", "arbitrary"),
            vmem_limit_bytes=_vmem_limit_bytes()),
    )


def _conv1_with_stats(x_bf16, w3):
    n, h, w, cin = x_bf16.shape
    cout = w3.shape[-1]
    ncores = 2 if n % 2 == 0 else 1
    return _conv_call(_conv1_kernel, n, h, w, cin, cout, [], ncores)(x_bf16, w3)


def _conv2_with_stats(y1, aff1, w3):
    n, h, w, cin = y1.shape
    cout = w3.shape[-1]
    ncores = 2 if n % 2 == 0 else 1
    aff_spec = pl.BlockSpec((2, cin), lambda c, i: (0, 0))
    return _conv_call(_conv2_kernel, n, h, w, cin, cout, [aff_spec],
                      ncores)(y1, aff1, w3)


def _apply_bn_res_relu(y2, aff2, res_f32):
    n, h, w, c = y2.shape
    target_rows = max(8, (2 * 1024 * 1024) // max(1, w * c * 4))
    th = _largest_divisor_leq(h, target_rows)

    def tile():
        return pl.BlockSpec((1, th, w, c), lambda i, j: (i, j, 0, 0))

    return pl.pallas_call(
        _bn_res_relu_kernel,
        grid=(n, h // th),
        in_specs=[tile(), pl.BlockSpec((2, c), lambda i, j: (0, 0)), tile()],
        out_specs=tile(),
        out_shape=jax.ShapeDtypeStruct((n, h, w, c), jnp.float32),
        compiler_params=pltpu.CompilerParams(
            dimension_semantics=("parallel", "parallel"),
            vmem_limit_bytes=_vmem_limit_bytes()),
    )(y2, aff2, res_f32)


# --------------------------- small host-side helpers -------------------------
def _weight_oihw_to_dy3(w_oihw):
    """(Cout, Cin, 3, 3) -> (3, 3*Cin, Cout); second index is dx*Cin + c."""
    cout, cin = w_oihw.shape[0], w_oihw.shape[1]
    return jnp.transpose(w_oihw, (2, 3, 1, 0)).reshape(3, 3 * cin, cout)


def _finalize_affine(sums, beta, count):
    """Fold BN(mean, biased var) and beta into per-channel (scale, shift)."""
    s = jnp.sum(sums, axis=0)                             # combine per-core partials
    mean = s[0] / count
    var = jnp.maximum(s[1] / count - mean * mean, 0.0)    # guard E[x^2]-E[x]^2 < 0
    rstd = jax.lax.rsqrt(var + _BN_EPS)
    shift = beta.astype(jnp.float32) - mean * rstd
    return jnp.stack([rstd, shift])                       # (2, C) f32


# --------------------------- ResBlock forward --------------------------------
def resblock_forward(x_nchw, w1_oihw, beta1, w2_oihw, beta2):
    n, c, h, w = x_nchw.shape
    cout = w1_oihw.shape[0]
    assert cout == c, "ResBlock residual requires in_channels == out_channels"
    count = float(n * h * w)

    x_nhwc = jnp.transpose(x_nchw, (0, 2, 3, 1)).astype(jnp.float32)
    w1_3 = _weight_oihw_to_dy3(w1_oihw).astype(jnp.bfloat16)
    w2_3 = _weight_oihw_to_dy3(w2_oihw).astype(jnp.bfloat16)

    # ConvBlock 1: conv(pad=-1) + streamed BN statistics (y1 kept in bf16).
    y1, sums1 = _conv1_with_stats(x_nhwc.astype(jnp.bfloat16), w1_3)
    aff1 = _finalize_affine(sums1, beta1, count)

    # ConvBlock 2: BN1-apply + beta1 + ReLU fused into the conv kernel + stats.
    y2, sums2 = _conv2_with_stats(y1, aff1, w2_3)
    aff2 = _finalize_affine(sums2, beta2, count)

    # BN2 + beta2 + residual + final ReLU (tiled elementwise pass, f32 out).
    out = _apply_bn_res_relu(y2, aff2, x_nhwc)
    return jnp.transpose(out, (0, 3, 1, 2))               # back to NCHW


# ---------------- pure-JAX reference (for correctness check) ----------------
def _conv_block_ref(x_nchw, w_oihw, beta, relu):
    xp = jnp.pad(x_nchw, ((0, 0), (0, 0), (1, 1), (1, 1)), constant_values=-1.0)
    y = jax.lax.conv_general_dilated(
        xp, w_oihw, (1, 1), "VALID",
        dimension_numbers=("NCHW", "OIHW", "NCHW"),
        precision=jax.lax.Precision.HIGHEST)
    mean = y.mean(axis=(0, 2, 3), keepdims=True)
    var = ((y - mean) ** 2).mean(axis=(0, 2, 3), keepdims=True)
    y = (y - mean) / jnp.sqrt(var + _BN_EPS) + beta.reshape(1, -1, 1, 1)
    return jnp.maximum(y, 0.0) if relu else y


def _resblock_ref(x, w1, b1, w2, b2):
    out = _conv_block_ref(x, w1, b1, True)
    out = _conv_block_ref(out, w2, b2, False)
    return jnp.maximum(out + x, 0.0)


if __name__ == "__main__":
    key = jax.random.PRNGKey(0)
    k1, k2, k3, k4, k5 = jax.random.split(key, 5)

    N, C, H, W = 2, 4, 16, 16  # in_channels == out_channels == 4
    x = jax.random.normal(k1, (N, C, H, W), jnp.float32)

    # kaiming_normal_(mode='fan_out', relu) -> std = sqrt(2 / (Cout*3*3))
    std = float(np.sqrt(2.0 / (C * 3 * 3)))
    w1 = jax.random.normal(k2, (C, C, 3, 3), jnp.float32) * std
    w2 = jax.random.normal(k3, (C, C, 3, 3), jnp.float32) * std
    # beta is zero-initialized in the module; use nonzero values so the +beta
    # path is actually exercised (still deterministic).
    beta1 = 0.25 * jax.random.normal(k4, (C,), jnp.float32)
    beta2 = 0.25 * jax.random.normal(k5, (C,), jnp.float32)

    out = resblock_forward(x, w1, beta1, w2, beta2)
    out = jax.block_until_ready(out)
    assert out.shape == (N, C, H, W)

    ref = _resblock_ref(x, w1, beta1, w2, beta2)
    # bf16 MXU inputs + bf16 y1/y2 intermediates across two conv+BN stages
    # => ~1-2% relative error vs the f32 HIGHEST-precision reference.
    np.testing.assert_allclose(np.asarray(out), np.asarray(ref), atol=6e-2, rtol=6e-2)

    print("KERNEL_OK")
</pallas_src>

<mosaic_0001>
module attributes {stable_mosaic.version = 11 : i64} {
  func.func @_conv1_kernel(%arg0: i32, %arg1: i32, %arg2: memref<1x16x16x4xbf16, #tpu.memory_space<vmem>>, %arg3: memref<3x12x4xbf16, #tpu.memory_space<vmem>>, %arg4: memref<1x16x16x4xbf16, #tpu.memory_space<vmem>>, %arg5: memref<1x2x4xf32, #tpu.memory_space<vmem>>, %arg6: memref<19x24x4xf32, #tpu.memory_space<vmem>>, %arg7: memref<384x4xf32, #tpu.memory_space<vmem>>) attributes {dimension_semantics = [#tpu.dimension_semantics<parallel>, #tpu.dimension_semantics<arbitrary>], iteration_bounds = array<i64: 2, 1>, scalar_prefetch = 0 : i64, scratch_operands = 2 : i64, tpu.core_type = #tpu.core_type<tc>, window_params = [{transform_indices = @transform_0, window_bounds = array<i64: 1, 16, 16, 4>}, {pipeline_mode = #tpu.pipeline_mode<synchronous>, transform_indices = @transform_1, window_bounds = array<i64: 3, 12, 4>}, {transform_indices = @transform_2, window_bounds = array<i64: 1, 16, 16, 4>}, {transform_indices = @transform_3, window_bounds = array<i64: 1, 2, 4>}]} {
    %c0 = arith.constant 0 : index
    %c0_0 = arith.constant 0 : index
    %c0_1 = arith.constant 0 : index
    %c0_2 = arith.constant 0 : index
    %0 = vector.load %arg2[%c0, %c0_0, %c0_1, %c0_2] : memref<1x16x16x4xbf16, #tpu.memory_space<vmem>>, vector<1x16x16x4xbf16>
    %1 = vector.shape_cast %0 : vector<1x16x16x4xbf16> to vector<16x16x4xbf16>
    %2 = arith.extf %1 : vector<16x16x4xbf16> to vector<16x16x4xf32>
    %c0_i32 = arith.constant 0 : i32
    %3 = arith.cmpi eq, %arg1, %c0_i32 : i32
    %4 = arith.extui %3 : i1 to i32
    %c0_i32_3 = arith.constant 0 : i32
    %5 = arith.cmpi ne, %4, %c0_i32_3 : i32
    scf.if %5 {
      %cst_43 = arith.constant -1.000000e+00 : f32
      %53 = vector.broadcast %cst_43 : f32 to vector<19x24x4xf32>
      %c0_44 = arith.constant 0 : index
      %c0_45 = arith.constant 0 : index
      %c0_46 = arith.constant 0 : index
      %54 = vector.load %arg6[%c0_44, %c0_45, %c0_46] : memref<19x24x4xf32, #tpu.memory_space<vmem>>, vector<19x24x4xf32>
      tpu.vector_store %arg6[%c0_44, %c0_45, %c0_46], %53 {strides = array<i32>} : memref<19x24x4xf32, #tpu.memory_space<vmem>>, vector<19x24x4xf32>,
      %cst_47 = arith.constant 0.000000e+00 : f32
      %55 = vector.broadcast %cst_47 : f32 to vector<1x2x4xf32>
      %c0_48 = arith.constant 0 : index
      %c0_49 = arith.constant 0 : index
      %c0_50 = arith.constant 0 : index
      %56 = vector.load %arg5[%c0_48, %c0_49, %c0_50] : memref<1x2x4xf32, #tpu.memory_space<vmem>>, vector<1x2x4xf32>
      tpu.vector_store %arg5[%c0_48, %c0_49, %c0_50], %55 {strides = array<i32>} : memref<1x2x4xf32, #tpu.memory_space<vmem>>, vector<1x2x4xf32>,
    } else {
    }
    %c1 = arith.constant 1 : index
    %c1_4 = arith.constant 1 : index
    %c0_5 = arith.constant 0 : index
    %6 = vector.load %arg6[%c1, %c1_4, %c0_5] : memref<19x24x4xf32, #tpu.memory_space<vmem>>, vector<16x16x4xf32>
    tpu.vector_store %arg6[%c1, %c1_4, %c0_5], %2 {strides = array<i32>} : memref<19x24x4xf32, #tpu.memory_space<vmem>>, vector<16x16x4xf32>,
    %c0_6 = arith.constant 0 : index
    %c0_7 = arith.constant 0 : index
    %c0_8 = arith.constant 0 : index
    %7 = vector.load %arg6[%c0_6, %c0_7, %c0_8] : memref<19x24x4xf32, #tpu.memory_space<vmem>>, vector<19x24x4xf32>
    %8 = arith.truncf %7 : vector<19x24x4xf32> to vector<19x24x4xbf16>
    %9 = vector.shape_cast %8 : vector<19x24x4xbf16> to vector<456x4xbf16>
    %10 = vector.extract_strided_slice %9 {offsets = [0, 0], sizes = [432, 4], strides = [1, 1]} : vector<456x4xbf16> to vector<432x4xbf16>
    %11 = vector.extract_strided_slice %9 {offsets = [1, 0], sizes = [432, 4], strides = [1, 1]} : vector<456x4xbf16> to vector<432x4xbf16>
    %12 = vector.extract_strided_slice %9 {offsets = [2, 0], sizes = [432, 4], strides = [1, 1]} : vector<456x4xbf16> to vector<432x4xbf16>
    %13 = tpu.concatenate %10, %11, %12 in 1 : vector<432x4xbf16>, vector<432x4xbf16>, vector<432x4xbf16> -> vector<432x12xbf16>
    %14 = vector.extract_strided_slice %13 {offsets = [0, 0], sizes = [384, 12], strides = [1, 1]} : vector<432x12xbf16> to vector<384x12xbf16>
    %c0_9 = arith.constant 0 : index
    %c0_10 = arith.constant 0 : index
    %c0_11 = arith.constant 0 : index
    %15 = vector.load %arg3[%c0_9, %c0_10, %c0_11] : memref<3x12x4xbf16, #tpu.memory_space<vmem>>, vector<1x12x4xbf16>
    %16 = vector.shape_cast %15 : vector<1x12x4xbf16> to vector<12x4xbf16>
    %cst = arith.constant dense<0.000000e+00> : vector<384x4xf32>
    %17 = tpu.matmul %14, %16, %cst {dimension_numbers = #tpu.dot_dimension_numbers<[1], [0], [0], [1], [0, 0, 1, 1], [], []>} : vector<384x12xbf16>, vector<12x4xbf16>, vector<384x4xf32> -> vector<384x4xf32>
    %c0_12 = arith.constant 0 : index
    %c0_13 = arith.constant 0 : index
    %18 = vector.load %arg7[%c0_12, %c0_13] : memref<384x4xf32, #tpu.memory_space<vmem>>, vector<384x4xf32>
    tpu.vector_store %arg7[%c0_12, %c0_13], %17 {strides = array<i32>} : memref<384x4xf32, #tpu.memory_space<vmem>>, vector<384x4xf32>,
    %19 = vector.extract_strided_slice %13 {offsets = [24, 0], sizes = [384, 12], strides = [1, 1]} : vector<432x12xbf16> to vector<384x12xbf16>
    %c1_14 = arith.constant 1 : index
    %c0_15 = arith.constant 0 : index
    %c0_16 = arith.constant 0 : index
    %20 = vector.load %arg3[%c1_14, %c0_15, %c0_16] : memref<3x12x4xbf16, #tpu.memory_space<vmem>>, vector<1x12x4xbf16>
    %21 = vector.shape_cast %20 : vector<1x12x4xbf16> to vector<12x4xbf16>
    %cst_17 = arith.constant dense<0.000000e+00> : vector<384x4xf32>
    %22 = tpu.matmul %19, %21, %cst_17 {dimension_numbers = #tpu.dot_dimension_numbers<[1], [0], [0], [1], [0, 0, 1, 1], [], []>} : vector<384x12xbf16>, vector<12x4xbf16>, vector<384x4xf32> -> vector<384x4xf32>
    %c0_18 = arith.constant 0 : index
    %c0_19 = arith.constant 0 : index
    %23 = vector.load %arg7[%c0_18, %c0_19] : memref<384x4xf32, #tpu.memory_space<vmem>>, vector<384x4xf32>
    %24 = arith.addf %23, %22 : vector<384x4xf32>
    %c0_20 = arith.constant 0 : index
    %c0_21 = arith.constant 0 : index
    %25 = vector.load %arg7[%c0_20, %c0_21] : memref<384x4xf32, #tpu.memory_space<vmem>>, vector<384x4xf32>
    tpu.vector_store %arg7[%c0_20, %c0_21], %24 {strides = array<i32>} : memref<384x4xf32, #tpu.memory_space<vmem>>, vector<384x4xf32>,
    %26 = vector.extract_strided_slice %13 {offsets = [48, 0], sizes = [384, 12], strides = [1, 1]} : vector<432x12xbf16> to vector<384x12xbf16>
    %c2 = arith.constant 2 : index
    %c0_22 = arith.constant 0 : index
    %c0_23 = arith.constant 0 : index
    %27 = vector.load %arg3[%c2, %c0_22, %c0_23] : memref<3x12x4xbf16, #tpu.memory_space<vmem>>, vector<1x12x4xbf16>
    %28 = vector.shape_cast %27 : vector<1x12x4xbf16> to vector<12x4xbf16>
    %cst_24 = arith.constant dense<0.000000e+00> : vector<384x4xf32>
    %29 = tpu.matmul %26, %28, %cst_24 {dimension_numbers = #tpu.dot_dimension_numbers<[1], [0], [0], [1], [0, 0, 1, 1], [], []>} : vector<384x12xbf16>, vector<12x4xbf16>, vector<384x4xf32> -> vector<384x4xf32>
    %c0_25 = arith.constant 0 : index
    %c0_26 = arith.constant 0 : index
    %30 = vector.load %arg7[%c0_25, %c0_26] : memref<384x4xf32, #tpu.memory_space<vmem>>, vector<384x4xf32>
    %31 = arith.addf %30, %29 : vector<384x4xf32>
    %c0_27 = arith.constant 0 : index
    %c0_28 = arith.constant 0 : index
    %32 = vector.load %arg7[%c0_27, %c0_28] : memref<384x4xf32, #tpu.memory_space<vmem>>, vector<384x4xf32>
    tpu.vector_store %arg7[%c0_27, %c0_28], %31 {strides = array<i32>} : memref<384x4xf32, #tpu.memory_space<vmem>>, vector<384x4xf32>,
    %c0_29 = arith.constant 0 : index
    %c0_30 = arith.constant 0 : index
    %33 = vector.load %arg7[%c0_29, %c0_30] : memref<384x4xf32, #tpu.memory_space<vmem>>, vector<384x4xf32>
    %34 = vector.shape_cast %33 : vector<384x4xf32> to vector<16x24x4xf32>
    %35 = vector.extract_strided_slice %34 {offsets = [0, 0, 0], sizes = [16, 16, 4], strides = [1, 1, 1]} : vector<16x24x4xf32> to vector<16x16x4xf32>
    %36 = arith.truncf %35 : vector<16x16x4xf32> to vector<16x16x4xbf16>
    %c0_31 = arith.constant 0 : index
    %c0_32 = arith.constant 0 : index
    %c0_33 = arith.constant 0 : index
    %c0_34 = arith.constant 0 : index
    %37 = vector.load %arg4[%c0_31, %c0_32, %c0_33, %c0_34] : memref<1x16x16x4xbf16, #tpu.memory_space<vmem>>, vector<1x16x16x4xbf16>
    %38 = vector.shape_cast %37 : vector<1x16x16x4xbf16> to vector<16x16x4xbf16>
    %39 = vector.shape_cast %36 : vector<16x16x4xbf16> to vector<1x16x16x4xbf16>
    tpu.vector_store %arg4[%c0_31, %c0_32, %c0_33, %c0_34], %39 {strides = array<i32>} : memref<1x16x16x4xbf16, #tpu.memory_space<vmem>>, vector<1x16x16x4xbf16>,
    %40 = vector.shape_cast %35 : vector<16x16x4xf32> to vector<256x4xf32>
    %cst_35 = arith.constant dense<0.000000e+00> : vector<4xf32>
    %41 = vector.multi_reduction <add>, %40, %cst_35 [0] : vector<256x4xf32> to vector<4xf32>
    %42 = vector.shape_cast %41 : vector<4xf32> to vector<1x4xf32>
    %43 = arith.mulf %40, %40 : vector<256x4xf32>
    %cst_36 = arith.constant dense<0.000000e+00> : vector<4xf32>
    %44 = vector.multi_reduction <add>, %43, %cst_36 [0] : vector<256x4xf32> to vector<4xf32>
    %45 = vector.shape_cast %44 : vector<4xf32> to vector<1x4xf32>
    %c0_37 = arith.constant 0 : index
    %c0_38 = arith.constant 0 : index
    %c0_39 = arith.constant 0 : index
    %46 = vector.load %arg5[%c0_37, %c0_38, %c0_39] : memref<1x2x4xf32, #tpu.memory_space<vmem>>, vector<1x2x4xf32>
    %47 = vector.shape_cast %46 : vector<1x2x4xf32> to vector<2x4xf32>
    %48 = tpu.concatenate %42, %45 in 0 : vector<1x4xf32>, vector<1x4xf32> -> vector<2x4xf32>
    %49 = arith.addf %47, %48 : vector<2x4xf32>
    %c0_40 = arith.constant 0 : index
    %c0_41 = arith.constant 0 : index
    %c0_42 = arith.constant 0 : index
    %50 = vector.load %arg5[%c0_40, %c0_41, %c0_42] : memref<1x2x4xf32, #tpu.memory_space<vmem>>, vector<1x2x4xf32>
    %51 = vector.shape_cast %50 : vector<1x2x4xf32> to vector<2x4xf32>
    %52 = vector.shape_cast %49 : vector<2x4xf32> to vector<1x2x4xf32>
    tpu.vector_store %arg5[%c0_40, %c0_41, %c0_42], %52 {strides = array<i32>} : memref<1x2x4xf32, #tpu.memory_space<vmem>>, vector<1x2x4xf32>,
    return
  }
  func.func @transform_0(%arg0: i32, %arg1: i32) -> (i32, i32, i32, i32) {
    %c1_i32 = arith.constant 1 : i32
    %0 = arith.muli %arg0, %c1_i32 : i32
    %1 = arith.addi %0, %arg1 : i32
    %c0_i32 = arith.constant 0 : i32
    %c0_i32_0 = arith.constant 0 : i32
    %c0_i32_1 = arith.constant 0 : i32
    %c0_i32_2 = arith.constant 0 : i32
    return %1, %c0_i32, %c0_i32_0, %c0_i32_1 : i32, i32, i32, i32
  }
  func.func @transform_1(%arg0: i32, %arg1: i32) -> (i32, i32, i32) {
    %c0_i32 = arith.constant 0 : i32
    %c0_i32_0 = arith.constant 0 : i32
    %c0_i32_1 = arith.constant 0 : i32
    %c0_i32_2 = arith.constant 0 : i32
    return %c0_i32, %c0_i32_0, %c0_i32_1 : i32, i32, i32
  }
  func.func @transform_2(%arg0: i32, %arg1: i32) -> (i32, i32, i32, i32) {
    %c1_i32 = arith.constant 1 : i32
    %0 = arith.muli %arg0, %c1_i32 : i32
    %1 = arith.addi %0, %arg1 : i32
    %c0_i32 = arith.constant 0 : i32
    %c0_i32_0 = arith.constant 0 : i32
    %c0_i32_1 = arith.constant 0 : i32
    %c0_i32_2 = arith.constant 0 : i32
    return %1, %c0_i32, %c0_i32_0, %c0_i32_1 : i32, i32, i32, i32
  }
  func.func @transform_3(%arg0: i32, %arg1: i32) -> (i32, i32, i32) {
    %c0_i32 = arith.constant 0 : i32
    %c0_i32_0 = arith.constant 0 : i32
    %c0_i32_1 = arith.constant 0 : i32
    return %arg0, %c0_i32, %c0_i32_0 : i32, i32, i32
  }
}

</mosaic_0001>

<bundles_post_ra>
// kernel: tpu_custom_call.1
= control target key start
LH: loop header
LB: loop body
LE: loop exit
PB: predicated region body
PF: predicated region fallthrough
CT: control target
= control target key end

     0   :  { %9 = vsyncpa [#allocation5], 0  ;;  %s4083_s0 = inlined_call_operand.vmem [shape: bf16[2,16,16,4], index: 0, kind: input, shape index: {}]   ;;  %s4084_s1 = inlined_call_operand.vmem [shape: bf16[3,12,4], index: 1, kind: input, shape index: {}]   ;;  %s4085_s2 = inlined_call_operand.vmem [shape: bf16[2,16,16,4], index: 2, kind: output, shape index: {0}]   ;;  %s4086_s3 = inlined_call_operand.hbm [shape: f32[2,2,4], index: 3, kind: output, shape index: {1}]  }
   0x1   :  { %11 = vsyncpa [#allocation5 + $0x1], 0  ;;  %s2813_s12 = smov 0   ;;  %s2815_s13 = smov 0  }
   0x2   :  { %s2817_s14 = smov 0   ;;  %s2819_s15 = smov 0  }
   0x3   :  { %s2821_s16 = smov 0   ;;  %s2823_s17 = smov 0  }
   0x4 LB: > { %s2461_s18 = sadd.s32 4294967295, %s2787_s17   ;;  %s2462_s19 = sadd.s32 4294967294, %s2787_s17   ;;  %s2787_s17 = sphi %s2823_s17, %s17_s17   ;;  %s2783_s16 = sphi %s2821_s16, %s4093_s16   ;;  %s2779_s15 = sphi %s2819_s15, %s4092_s15   ;;  %s2775_s14 = sphi %s2817_s14, %s4091_s14   ;;  %s2771_s13 = sphi %s2815_s13, %s4090_s13   ;;  %s2767_s12 = sphi %s2813_s12, %s4089_s12  }
   0x5   : > { %s29_s20 = sadd.s32 1, %s2783_s16  ;;  %s113_s21 = sadd.s32 1, %s2775_s14 }
   0x6   : > { %p31_p0 = scmp.ge.s32.totalorder %s29_s20, 2  ;;  %p123_p1 = scmp.ne.s32.totalorder %s2775_s14, %s2771_s13 }
   0x7   : > { %p124_p2 = scmp.eq.s32.totalorder %s2461_s18, 1  ;;  %p129_p3 = scmp.ne.s32.totalorder %s2771_s13, %s2767_s12 }
   0x8   : > { %s4095_s20 = smov (%p31_p0, %s29_s20), 0  ;;  %p130_p5 = scmp.eq.s32.totalorder %s2462_s19, 1 }
   0x9   : > { %p2853_p4 = por %p124_p2, %p123_p1  ;;  %s110_s23 = ssub.s32 %s2783_s16, %s4095_s20 }
   0xa   : > { %p2465_p6 = scmp.ge.s32.totalorder %s2787_s17, 1  ;;  %p111_p7 = scmp.eq.s32.totalorder %s110_s23, 0 }
   0xb   : > { %p2860_p8 = por %p130_p5, %p129_p3  ;;  %p161_p9 = scmp.lt.s32.totalorder %s2787_s17, 3 }
   0xc   : > { %s2866_s25 = scalar_select %p111_p7, %s2775_s14, %s113_s21  }
   0xd   : > { %p162_p10 = pnand %p2465_p6, %p161_p9 }
   0xe   : > { %p193_p11 = scmp.lt.s32.totalorder (!%p162_p10), %s2779_s15, 1  ;;  %s2790_s4 = smov (!%p162_p10), 4  }
   0xf   : > { %165 = sbr.rel (%p162_p10) target bundleno = 681 (0x2a9), region = 28  ;;  %s2791_s5 = smov (!%p162_p10), 8  }
  0x10   : > { %s2560_s7 = sshll.u32 (!%p162_p10), %s2779_s15, 1  ;;  %s2729_s29 = scalar_lea.hbm (!%p162_p10), %s4086_s3, 4 }
  0x11   : > { %s2363_s10 = scalar_lea.hbm (!%p162_p10), %s4086_s3, %s2560_s7 }
  0x12   : > { %s2367_s18 = sshll.u32 (!%p162_p10), %s2363_s10, 4  ;;  %s2368_s18 = int_to_ptr.hbm [resolvable:$true] %s2367_s18 }
  0x13   : > { %s2723_s19 = sshra.s32 (!%p162_p10), %s2368_s18, 4  ;;  %s2724_s19 = int_to_ptr.hbm [resolvable:$true] %s2723_s19 }
  0x14   : > { %vm275_vm0 = vcmask 31744   ;;  %v2789_v0 = vmov -1.0   ;;  %s2872_s26 = scalar_select %p193_p11, %s2779_s15, 1  ;;  %vm617_vm1 = vsmask.f32 7424  ;;  %vm892_vm2 = vcmask 1046528  }
  0x15   : > { %276 = vst.msk [vmem:[#allocation2] sm:$0xff] %vm275_vm0, %v2789_v0  ;;  %vm1167_vm3 = vcmask 1045504   ;;  %vm1056_vm4 = vcmask 64512   ;;  %vm1118_vm5 = vcmask 97280   ;;  %vm1376_vm6 = vcmask 1043456   ;;  %s2725_s21 = scalar_lea.hbm %s2724_s19, 2  ;;  %p2730_p1 = scmp.lt.s32.totalorder %s2724_s19, %s4086_s3 }
  0x16   : > { %277 = vst.msk [vmem:[#allocation2 + $0x8] sm:$0xff] %vm275_vm0, %v2789_v0  ;;  %s2563_s27 = sshll.u32 %s2872_s26, 7  ;;  %vm2133_vm7 = vcmask 27648   ;;  %s189_s26 = sand.u32 1, %s2771_s13   ;;  %vm333_vm8 = vcmask 25600   ;;  %vm2337_vm9 = vcmask 1040384  }
  0x17   : > { %278 = vst.msk [vmem:[#allocation2 + $0x10] sm:$0xff] %vm275_vm0, %v2789_v0  ;;  %s2886_s30 = scalar_lea.vmem %s4083_s0, %s2563_s27  ;;  %s3553_s6 = scalar_lea.vmem %s4085_s2, %s2563_s27 }
  0x18   : > { %279 = vst.msk [vmem:[#allocation2 + $0x18] sm:$0xff] %vm275_vm0, %v2789_v0  ;;  %v2891_v1 = vld [vmem:[%s2886_s30] sm:$0xff]   ;;  %v2632_v27 = vld [vmem:[%s2886_s30 + $0x8] sm:$0xff]   ;;  %v2633_v29 = vld [vmem:[%s2886_s30 + $0x10] sm:$0xff]   ;;  %s2466_s27 = sshll.u32 %s189_s26, 1  ;;  %s2349_s15 = scalar_lea.sflag [#allocation5], %s189_s26 }
  0x19   : > { %280 = vst.msk [vmem:[#allocation2 + $0x20] sm:$0xff] %vm275_vm0, %v2789_v0  ;;  %v2570_v2 = vunpack.c.l.bf16 %v2891_v1  ;;  %v2571_v28 = vunpack.c.h.bf16 %v2891_v1  ;;  %v2574_v30 = vunpack.c.l.bf16 %v2632_v27  ;;  %v2642_v31 = vld [vmem:[%s2886_s30 + $0x58] sm:$0xff]   ;;  %v2575_v32 = vunpack.c.h.bf16 %v2632_v27  ;;  %v2643_v34 = vld [vmem:[%s2886_s30 + $0x60] sm:$0xff]   ;;  %p2726_p12 = scmp.ne.s32.totalorder %s2724_s19, %s2725_s21  ;;  %p2731_p2 = scmp.lt.s32.totalorder %s2729_s29, %s2725_s21 }
  0x1a   : > { %281 = vst.msk [vmem:[#allocation2 + $0x28] sm:$0xff] %vm275_vm0, %v2789_v0  ;;  %v2578_v33 = vunpack.c.l.bf16 %v2633_v29  ;;  %v2614_v35 = vunpack.c.l.bf16 %v2642_v31  ;;  %v2615_v36 = vunpack.c.h.bf16 %v2642_v31  ;;  %v2634_v37 = vld [vmem:[%s2886_s30 + $0x18] sm:$0xff]   ;;  %v2618_v38 = vunpack.c.l.bf16 %v2643_v34  ;;  %v3028_v45 = vld [vmem:[%s2886_s30 + $0x20] sm:$0xff]  }
  0x1b   : > { %282 = vst.msk [vmem:[#allocation2 + $0x30] sm:$0xff] %vm275_vm0, %v2789_v0  ;;  %v2579_v39 = vunpack.c.h.bf16 %v2633_v29  ;;  %v2582_v40 = vunpack.c.l.bf16 %v2634_v37  ;;  %v2583_v41 = vunpack.c.h.bf16 %v2634_v37  ;;  %v2619_v42 = vunpack.c.h.bf16 %v2643_v34  ;;  %p2727_p13 = pnand %p2726_p12, %p2853_p4  ;;  %p2732_p3 = por %p2731_p2, %p2730_p1 }
  0x1c   : > { %v369_v3 = vld [vmem:[#allocation2] sm:$0xff]  ;;  %283 = vst.msk [vmem:[#allocation2 + $0x38] sm:$0xff] %vm275_vm0, %v2789_v0  ;;  %v2586_v49 = vunpack.c.l.bf16 %v3028_v45 }
  0x1d   : > { %337 = vst.msk [vmem:[#allocation2 + $0x19] sm:$0xff] %vm275_vm0, %v2570_v2  ;;  %v370_v4 = vld [vmem:[#allocation2 + $0x8] sm:$0xff]  ;;  %v424_v5 = vpack.c.bf16 %v369_v3, %v369_v3  ;;  %p2728_p0 = pneg %p2727_p13 }
  0x1e   : > { %v371_v6 = vld [vmem:[#allocation2 + $0x10] sm:$0xff]  ;;  %v425_v7 = vpack.c.bf16 %v370_v4, %v370_v4  ;;  %284 = vst.msk [vmem:[#allocation2 + $0x40] sm:$0xff] %vm275_vm0, %v2789_v0 }
  0x1f   : > { %v533_v8 = vunpack.c.l.b16 %v424_v5  ;;  %285 = vst.msk [vmem:[#allocation2 + $0x48] sm:$0xff] %vm275_vm0, %v2789_v0  ;;  %v426_v10 = vpack.c.bf16 %v371_v6, %v371_v6  ;;  %p2733_p5 = pnand %p2732_p3, %p2728_p0 }
  0x20   : > { %v534_v9 = vunpack.c.l.b16 %v425_v7  ;;  %286 = vst.msk [vmem:[#allocation2 + $0x50] sm:$0xff] %vm275_vm0, %v2789_v0 }
  0x21   : > { %287 = vst.msk [vmem:[#allocation2 + $0x58] sm:$0xff] %vm275_vm0, %v2789_v0  ;;  %v535_v15 = vunpack.c.l.b16 %v426_v10 }
  0x22   : > { %v2909_v11 = vpack.c.b16 %v534_v9, %v533_v8  ;;  %288 = vst.msk [vmem:[#allocation2 + $0x60] sm:$0xff] %vm275_vm0, %v2789_v0 }
  0x23   : > { %289 = vst.msk [vmem:[#allocation2 + $0x68] sm:$0xff] %vm275_vm0, %v2789_v0 }
  0x24   : > { %v372_v12 = vld [vmem:[#allocation2 + $0x18] sm:$0xff]  ;;  %v621_v13 = vshll.u32 %v2909_v11, 16  ;;  %290 = vst.msk [vmem:[#allocation2 + $0x70] sm:$0xff] %vm275_vm0, %v2789_v0  ;;  %v619_v17 = vshrl.u32 %v2909_v11, 16  ;;  %v893_v24 = vrot.slane %v2909_v11, 1 }
  0x25   : > { %v427_v14 = vpack.c.bf16 %v372_v12, %v372_v12  ;;  %291 = vst.msk [vmem:[#allocation2 + $0x78] sm:$0xff] %vm275_vm0, %v2789_v0 }
  0x26   : > { %292 = vst.msk [vmem:[#allocation2 + $0x80] sm:$0xff] %vm275_vm0, %v2789_v0  ;;  %v623_v18 = vrot.slane %v621_v13, 1 }
  0x27   : > { %v536_v16 = vunpack.c.l.b16 %v427_v14  ;;  %293 = vst.msk [vmem:[#allocation2 + $0x88] sm:$0xff] %vm275_vm0, %v2789_v0 }
  0x28   : > { %294 = vst.msk [vmem:[#allocation2 + $0x90] sm:$0xff] %vm275_vm0, %v2789_v0  ;;  %v624_v20 = vor.u32 %v623_v18, %v619_v17 }
  0x29   : > { %v2927_v19 = vpack.c.b16 %v536_v16, %v535_v15  ;;  %295 = vst.msk [vmem:[#allocation2 + $0x98] sm:$0xff] %vm275_vm0, %v2789_v0 }
  0x2a   : > { %296 = vst.msk [vmem:[#allocation2 + $0xa0] sm:$0xff] %vm275_vm0, %v2789_v0 }
  0x2b   : > { %v626_v21 = vshll.u32 %v2927_v19, 16  ;;  %297 = vst.msk [vmem:[#allocation2 + $0xa8] sm:$0xff] %vm275_vm0, %v2789_v0  ;;  %v894_v25 = vrot.slane %v2927_v19, 1  ;;  %v630_v50 = vshrl.u32 %v2927_v19, 16 }
  0x2c   : > { %298 = vst.msk [vmem:[#allocation2 + $0xb0] sm:$0xff] %vm275_vm0, %v2789_v0 }
  0x2d   : > { %v2938_v22 = vrot.slane %v626_v21, 1  ;;  %299 = vst.msk [vmem:[#allocation2 + $0xb8] sm:$0xff] %vm275_vm0, %v2789_v0  ;;  %v895_v26 = vsel %vm892_vm2, %v893_v24, %v894_v25 }
  0x2e   : > { %300 = vst.msk [vmem:[#allocation2 + $0xc0] sm:$0xff] %vm275_vm0, %v2789_v0 }
  0x2f   : > { %v629_v23 = vsel %vm617_vm1, %v624_v20, %v2938_v22  ;;  %301 = vst.msk [vmem:[#allocation2 + $0xc8] sm:$0xff] %vm275_vm0, %v2789_v0  ;;  %v632_v4 = vor.u32 %v630_v50, %v2938_v22 }
  0x30   : > { %838 = vrot.lane.b32.xlu0 %v629_v23, %s2790_s4  ;;  %302 = vst.msk [vmem:[#allocation2 + $0xd0] sm:$0xff] %vm275_vm0, %v2789_v0 }
  0x31   : > { %303 = vst.msk [vmem:[#allocation2 + $0xd8] sm:$0xff] %vm275_vm0, %v2789_v0 }
  0x32   : > { %304 = vst.msk [vmem:[#allocation2 + $0xe0] sm:$0xff] %vm275_vm0, %v2789_v0 }
  0x33   : > { %305 = vst.msk [vmem:[#allocation2 + $0xe8] sm:$0xff] %vm275_vm0, %v2789_v0 }
  0x34   : > { %306 = vst.msk [vmem:[#allocation2 + $0xf0] sm:$0xff] %vm275_vm0, %v2789_v0 }
  0x35   : > { %307 = vst.msk [vmem:[#allocation2 + $0xf8] sm:$0xff] %vm275_vm0, %v2789_v0 }
  0x36   : > { %308 = vst.msk [vmem:[#allocation2 + $0x100] sm:$0xff] %vm275_vm0, %v2789_v0 }
  0x37   : > { %309 = vst.msk [vmem:[#allocation2 + $0x108] sm:$0xff] %vm275_vm0, %v2789_v0 }
  0x38   : > { %310 = vst.msk [vmem:[#allocation2 + $0x110] sm:$0xff] %vm275_vm0, %v2789_v0  ;;  %948 = vrot.lane.b32.xlu0 %v895_v26, %s2791_s5 }
  0x39   : > { %311 = vst.msk [vmem:[#allocation2 + $0x118] sm:$0xff] %vm275_vm0, %v2789_v0 }
  0x3a   : > { %312 = vst.msk [vmem:[#allocation2 + $0x120] sm:$0xff] %vm275_vm0, %v2789_v0 }
  0x3b   : > { %313 = vst.msk [vmem:[#allocation2 + $0x128] sm:$0xff] %vm275_vm0, %v2789_v0 }
  0x3c   : > { %314 = vst.msk [vmem:[#allocation2 + $0x130] sm:$0xff] %vm275_vm0, %v2789_v0 }
  0x3d   : > { %315 = vst.msk [vmem:[#allocation2 + $0x138] sm:$0xff] %vm275_vm0, %v2789_v0 }
  0x3e   : > { %316 = vst.msk [vmem:[#allocation2 + $0x140] sm:$0xff] %vm275_vm0, %v2789_v0 }
  0x3f   : > { %317 = vst.msk [vmem:[#allocation2 + $0x148] sm:$0xff] %vm275_vm0, %v2789_v0 }
  0x40   : > { %318 = vst.msk [vmem:[#allocation2 + $0x150] sm:$0xff] %vm275_vm0, %v2789_v0 }
  0x41   : > { %319 = vst.msk [vmem:[#allocation2 + $0x158] sm:$0xff] %vm275_vm0, %v2789_v0 }
  0x42   : > { %320 = vst.msk [vmem:[#allocation2 + $0x160] sm:$0xff] %vm275_vm0, %v2789_v0 }
  0x43   : > { %321 = vst.msk [vmem:[#allocation2 + $0x168] sm:$0xff] %vm275_vm0, %v2789_v0 }
  0x44   : > { %322 = vst.msk [vmem:[#allocation2 + $0x170] sm:$0xff] %vm275_vm0, %v2789_v0 }
  0x45   : > { %323 = vst.msk [vmem:[#allocation2 + $0x178] sm:$0xff] %vm275_vm0, %v2789_v0 }
  0x46   : > { %324 = vst.msk [vmem:[#allocation2 + $0x180] sm:$0xff] %vm275_vm0, %v2789_v0 }
  0x47   : > { %325 = vst.msk [vmem:[#allocation2 + $0x188] sm:$0xff] %vm275_vm0, %v2789_v0 }
  0x48   : > { %326 = vst.msk [vmem:[#allocation2 + $0x190] sm:$0xff] %vm275_vm0, %v2789_v0 }
  0x49   : > { %327 = vst.msk [vmem:[#allocation2 + $0x198] sm:$0xff] %vm275_vm0, %v2789_v0 }
  0x4a   : > { %328 = vst.msk [vmem:[#allocation2 + $0x1a0] sm:$0xff] %vm275_vm0, %v2789_v0 }
  0x4b   : > { %329 = vst.msk [vmem:[#allocation2 + $0x1a8] sm:$0xff] %vm275_vm0, %v2789_v0 }
  0x4c   : > { %330 = vst.msk [vmem:[#allocation2 + $0x1b0] sm:$0xff] %vm275_vm0, %v2789_v0 }
  0x4d   : > { %338 = vst.msk [vmem:[#allocation2 + $0x21] sm:$0xff] %vm275_vm0, %v2571_v28 }
  0x4e   : > { %339 = vst.msk [vmem:[#allocation2 + $0x31] sm:$0xff] %vm275_vm0, %v2574_v30 }
  0x4f   : > { %340 = vst.msk [vmem:[#allocation2 + $0x39] sm:$0xff] %vm275_vm0, %v2575_v32 }
  0x50   : > { %341 = vst.msk [vmem:[#allocation2 + $0x49] sm:$0xff] %vm275_vm0, %v2578_v33 }
  0x51   : > { %359 = vst.msk [vmem:[#allocation2 + $0x121] sm:$0xff] %vm275_vm0, %v2614_v35 }
  0x52   : > { %360 = vst.msk [vmem:[#allocation2 + $0x129] sm:$0xff] %vm275_vm0, %v2615_v36 }
  0x53   : > { %361 = vst.msk [vmem:[#allocation2 + $0x139] sm:$0xff] %vm275_vm0, %v2618_v38 }
  0x54   : > { %v373_v43 = vld [vmem:[#allocation2 + $0x20] sm:$0xff]  ;;  %v374_v44 = vld [vmem:[#allocation2 + $0x28] sm:$0xff]  ;;  %342 = vst.msk [vmem:[#allocation2 + $0x51] sm:$0xff] %vm275_vm0, %v2579_v39 }
  0x55   : > { %v428_v46 = vpack.c.bf16 %v373_v43, %v373_v43  ;;  %v429_v47 = vpack.c.bf16 %v374_v44, %v374_v44  ;;  %v375_v48 = vld [vmem:[#allocation2 + $0x30] sm:$0xff]  ;;  %343 = vst.msk [vmem:[#allocation2 + $0x61] sm:$0xff] %vm275_vm0, %v2582_v40 }
  0x56   : > { %v376_v51 = vld [vmem:[#allocation2 + $0x38] sm:$0xff]  ;;  %v430_v52 = vpack.c.bf16 %v375_v48, %v375_v48  ;;  %v377_v53 = vld [vmem:[#allocation2 + $0x40] sm:$0xff]  ;;  %344 = vst.msk [vmem:[#allocation2 + $0x69] sm:$0xff] %vm275_vm0, %v2583_v41 }
  0x57   : > { %v537_v54 = vunpack.c.l.b16 %v428_v46  ;;  %v538_v55 = vunpack.c.l.b16 %v429_v47  ;;  %v431_v56 = vpack.c.bf16 %v376_v51, %v376_v51  ;;  %v378_v57 = vld [vmem:[#allocation2 + $0x48] sm:$0xff]  ;;  %v432_v58 = vpack.c.bf16 %v377_v53, %v377_v53  ;;  %362 = vst.msk [vmem:[#allocation2 + $0x141] sm:$0xff] %vm275_vm0, %v2619_v42 }
  0x58   : > { %v539_v59 = vunpack.c.l.b16 %v430_v52  ;;  %v433_v60 = vpack.c.bf16 %v378_v57, %v378_v57  ;;  %v405_v61 = vld [vmem:[#allocation2 + $0x120] sm:$0xff]  ;;  %345 = vst.msk [vmem:[#allocation2 + $0x79] sm:$0xff] %vm275_vm0, %v2586_v49 }
  0x59   : > { %v3036_v62 = vpack.c.b16 %v538_v55, %v537_v54  ;;  %v540_v63 = vunpack.c.l.b16 %v431_v56  ;;  %v541_v0 = vunpack.c.l.b16 %v432_v58  ;;  %v406_v1 = vld [vmem:[#allocation2 + $0x128] sm:$0xff]  ;;  %v407_v2 = vld [vmem:[#allocation2 + $0x130] sm:$0xff]  ;;  %v460_v3 = vpack.c.bf16 %v405_v61, %v405_v61 }
  0x5a   : > { %v542_v5 = vunpack.c.l.b16 %v433_v60  ;;  %v408_v6 = vld [vmem:[#allocation2 + $0x138] sm:$0xff]  ;;  %v461_v7 = vpack.c.bf16 %v406_v1, %v406_v1  ;;  %v462_v8 = vpack.c.bf16 %v407_v2, %v407_v2 }
  0x5b   : > { %v634_v9 = vshll.u32 %v3036_v62, 16  ;;  %v3040_v10 = vpack.c.b16 %v540_v63, %v539_v59  ;;  %v638_v12 = vshrl.u32 %v3036_v62, 16  ;;  %v463_v13 = vpack.c.bf16 %v408_v6, %v408_v6  ;;  %v379_v30 = vld [vmem:[#allocation2 + $0x50] sm:$0xff]  ;;  %v380_v31 = vld [vmem:[#allocation2 + $0x58] sm:$0xff] }
  0x5c   : > { %v3043_v14 = vpack.c.b16 %v542_v5, %v541_v0  ;;  %v569_v15 = vunpack.c.l.b16 %v460_v3  ;;  %v570_v16 = vunpack.c.l.b16 %v461_v7  ;;  %v571_v17 = vunpack.c.l.b16 %v462_v8  ;;  %v381_v35 = vld [vmem:[#allocation2 + $0x60] sm:$0xff] }
  0x5d   : > { %v636_v18 = vrot.slane %v634_v9, 1  ;;  %v642_v20 = vshll.u32 %v3040_v10, 16  ;;  %v646_v21 = vshrl.u32 %v3040_v10, 16  ;;  %v572_v23 = vunpack.c.l.b16 %v463_v13  ;;  %v382_v36 = vld [vmem:[#allocation2 + $0x68] sm:$0xff]  ;;  %v383_v9 = vld [vmem:[#allocation2 + $0x70] sm:$0xff] }
  0x5e   : > { %v650_v22 = vshll.u32 %v3043_v14, 16  ;;  %v3048_v24 = vpack.c.b16 %v570_v16, %v569_v15  ;;  %v896_v29 = vrot.slane %v3036_v62, 1  ;;  %v898_v38 = vrot.slane %v3040_v10, 1  ;;  %v409_v46 = vld [vmem:[#allocation2 + $0x140] sm:$0xff]  ;;  %v410_v47 = vld [vmem:[#allocation2 + $0x148] sm:$0xff]  ;;  %v2645_v15 = vld [vmem:[%s2886_s30 + $0x70] sm:$0xff]  }
  0x5f   : > { %v637_v26 = vsel %vm617_vm1, %v632_v4, %v636_v18  ;;  %v640_v27 = vor.u32 %v638_v12, %v636_v18  ;;  %v644_v28 = vrot.slane %v642_v20, 1  ;;  %v3053_v33 = vpack.c.b16 %v572_v23, %v571_v17  ;;  %v384_v12 = vld [vmem:[#allocation2 + $0x78] sm:$0xff]  ;;  %v2644_v13 = vld [vmem:[%s2886_s30 + $0x68] sm:$0xff]  }
  0x60   : > { %840 = vrot.lane.b32.xlu1 %v637_v26, %s2790_s4  ;;  %v652_v32 = vrot.slane %v650_v22, 1  ;;  %v762_v34 = vshll.u32 %v3048_v24, 16  ;;  %v766_v39 = vshrl.u32 %v3048_v24, 16  ;;  %v897_v40 = vsel %vm892_vm2, %v894_v25, %v896_v29 }
  0x61   : > { %v648_v37 = vor.u32 %v646_v21, %v644_v28  ;;  %v770_v42 = vshll.u32 %v3053_v33, 16  ;;  %950 = vrot.lane.b32.xlu2 %v897_v40, %s2791_s5  ;;  %v434_v43 = vpack.c.bf16 %v379_v30, %v379_v30  ;;  %v435_v44 = vpack.c.bf16 %v380_v31, %v380_v31  ;;  %v2636_v21 = vld [vmem:[%s2886_s30 + $0x28] sm:$0xff]  }
  0x62   : > { %v3061_v41 = vrot.slane %v762_v34, 1  ;;  %v645_v48 = vsel %vm617_vm1, %v640_v27, %v644_v28  ;;  %v436_v50 = vpack.c.bf16 %v381_v35, %v381_v35  ;;  %v437_v51 = vpack.c.bf16 %v382_v36, %v382_v36 }
  0x63   : > { %v653_v49 = vsel %vm617_vm1, %v648_v37, %v652_v32  ;;  %v772_v52 = vrot.slane %v770_v42, 1  ;;  %v543_v53 = vunpack.c.l.b16 %v434_v43  ;;  %v544_v54 = vunpack.c.l.b16 %v435_v44 }
  0x64   : > { %844 = vrot.lane.b32.xlu0 %v653_v49, %s2790_s4  ;;  %v768_v25 = vor.u32 %v766_v39, %v3061_v41  ;;  %v545_v55 = vunpack.c.l.b16 %v436_v50  ;;  %v546_v56 = vunpack.c.l.b16 %v437_v51  ;;  %v464_v57 = vpack.c.bf16 %v409_v46, %v409_v46 }
  0x65   : > { %v465_v58 = vpack.c.bf16 %v410_v47, %v410_v47  ;;  %v3069_v59 = vpack.c.b16 %v544_v54, %v543_v53  ;;  %v899_v61 = vsel %vm892_vm2, %v896_v29, %v898_v38  ;;  %v654_v63 = vshrl.u32 %v3043_v14, 16 }
  0x66   : > { %v3071_v60 = vpack.c.b16 %v546_v56, %v545_v55  ;;  %v900_v0 = vrot.slane %v3043_v14, 1  ;;  %v773_v1 = vsel %vm617_vm1, %v768_v25, %v772_v52  ;;  %v573_v5 = vunpack.c.l.b16 %v464_v57 }
  0x67   : > { %v658_v2 = vshll.u32 %v3069_v59, 16  ;;  %v662_v3 = vshrl.u32 %v3069_v59, 16  ;;  %v574_v6 = vunpack.c.l.b16 %v465_v58  ;;  %v656_v8 = vor.u32 %v654_v63, %v652_v32 }
  0x68   : > { %842 = vrot.lane.b32.xlu1 %v645_v48, %s2790_s4  ;;  %v666_v4 = vshll.u32 %v3071_v60, 16  ;;  %v901_v16 = vsel %vm892_vm2, %v898_v38, %v900_v0  ;;  %v438_v22 = vpack.c.bf16 %v383_v9, %v383_v9  ;;  %v439_v23 = vpack.c.bf16 %v384_v12, %v384_v12 }
  0x69   : > { %v660_v7 = vrot.slane %v658_v2, 1  ;;  %952 = vrot.lane.b32.xlu2 %v899_v61, %s2791_s5  ;;  %v3088_v20 = vpack.c.b16 %v574_v6, %v573_v5  ;;  %v2622_v26 = vunpack.c.l.bf16 %v2644_v13  ;;  %v2623_v27 = vunpack.c.h.bf16 %v2644_v13 }
  0x6a   : > { %v3086_v18 = vrot.slane %v666_v4, 1  ;;  %v2626_v29 = vunpack.c.l.bf16 %v2645_v15  ;;  %v2587_v30 = vunpack.c.h.bf16 %v3028_v45  ;;  %v2590_v31 = vunpack.c.l.bf16 %v2636_v21  ;;  %v3129_v4 = vld [vmem:[%s2886_s30 + $0x30] sm:$0xff]  }
  0x6b   : > { %v664_v17 = vor.u32 %v662_v3, %v660_v7  ;;  %v661_v28 = vsel %vm617_vm1, %v656_v8, %v660_v7  ;;  %363 = vst.msk [vmem:[#allocation2 + $0x151] sm:$0xff] %vm275_vm0, %v2622_v26  ;;  %v902_v32 = vrot.slane %v3069_v59, 1  ;;  %v2591_v35 = vunpack.c.h.bf16 %v2636_v21 }
  0x6c   : > { %874 = vrot.lane.b32.xlu0 %v773_v1, %s2790_s4  ;;  %364 = vst.msk [vmem:[#allocation2 + $0x159] sm:$0xff] %vm275_vm0, %v2623_v27  ;;  %v774_v36 = vshrl.u32 %v3053_v33, 16  ;;  %v778_v37 = vshll.u32 %v3088_v20, 16  ;;  %v547_v45 = vunpack.c.l.b16 %v438_v22  ;;  %v548_v38 = vunpack.c.l.b16 %v439_v23 }
  0x6d   : > { %v669_v34 = vsel %vm617_vm1, %v664_v17, %v3086_v18  ;;  %365 = vst.msk [vmem:[#allocation2 + $0x169] sm:$0xff] %vm275_vm0, %v2626_v29  ;;  %v928_v39 = vrot.slane %v3048_v24, 1  ;;  %v2627_v40 = vunpack.c.h.bf16 %v2645_v15  ;;  %v903_v42 = vsel %vm892_vm2, %v900_v0, %v902_v32 }
  0x6e   : > { %346 = vst.msk [vmem:[#allocation2 + $0x81] sm:$0xff] %vm275_vm0, %v2587_v30  ;;  %v930_v43 = vrot.slane %v3053_v33, 1  ;;  %v932_v44 = vrot.slane %v3088_v20, 1  ;;  %v776_v46 = vor.u32 %v774_v36, %v772_v52  ;;  %v780_v47 = vrot.slane %v778_v37, 1 }
  0x6f   : > { %347 = vst.msk [vmem:[#allocation2 + $0x91] sm:$0xff] %vm275_vm0, %v2590_v31  ;;  %v3113_v48 = vpack.c.b16 %v548_v38, %v547_v45  ;;  %v670_v51 = vshrl.u32 %v3071_v60, 16  ;;  %v904_v55 = vrot.slane %v3071_v60, 1  ;;  %v2594_v17 = vunpack.c.l.bf16 %v3129_v4 }
  0x70   : > { %954 = vrot.lane.b32.xlu1 %v901_v16, %s2791_s5  ;;  %348 = vst.msk [vmem:[#allocation2 + $0x99] sm:$0xff] %vm275_vm0, %v2591_v35  ;;  %v931_v49 = vsel %vm892_vm2, %v928_v39, %v930_v43  ;;  %v933_v52 = vsel %vm892_vm2, %v930_v43, %v932_v44  ;;  %v781_v61 = vsel %vm617_vm1, %v776_v46, %v780_v47  ;;  %v782_v31 = vshrl.u32 %v3088_v20, 16 }
  0x71   : > { %846 = vrot.lane.b32.xlu2 %v661_v28, %s2790_s4  ;;  %366 = vst.msk [vmem:[#allocation2 + $0x171] sm:$0xff] %vm275_vm0, %v2627_v40  ;;  %v674_v63 = vshll.u32 %v3113_v48, 16  ;;  %v906_v12 = vrot.slane %v3113_v48, 1  ;;  %v672_v28 = vor.u32 %v670_v51, %v3086_v18  ;;  %v905_v30 = vsel %vm892_vm2, %v902_v32, %v904_v55 }
  0x72   : > { %v411_v50 = vld [vmem:[#allocation2 + $0x150] sm:$0xff]  ;;  %349 = vst.msk [vmem:[#allocation2 + $0xa9] sm:$0xff] %vm275_vm0, %v2594_v17  ;;  %v784_v32 = vor.u32 %v782_v31, %v780_v47  ;;  %v2646_v47 = vld [vmem:[%s2886_s30 + $0x78] sm:$0xff]  }
  0x73   : > { %v412_v25 = vld [vmem:[#allocation2 + $0x158] sm:$0xff]  ;;  %v466_v53 = vpack.c.bf16 %v411_v50, %v411_v50  ;;  %v413_v54 = vld [vmem:[#allocation2 + $0x160] sm:$0xff]  ;;  %v907_v35 = vsel %vm892_vm2, %v904_v55, %v906_v12  ;;  %v678_v55 = vshrl.u32 %v3113_v48, 16 }
  0x74   : > { %848 = vrot.lane.b32.xlu0 %v669_v34, %s2790_s4  ;;  %v467_v56 = vpack.c.bf16 %v412_v25, %v412_v25  ;;  %v414_v57 = vld [vmem:[#allocation2 + $0x168] sm:$0xff]  ;;  %v468_v58 = vpack.c.bf16 %v413_v54, %v413_v54  ;;  %v676_v34 = vrot.slane %v674_v63, 1 }
  0x75   : > { %v575_v0 = vunpack.c.l.b16 %v466_v53  ;;  %v469_v1 = vpack.c.bf16 %v414_v57, %v414_v57  ;;  %v385_v2 = vld [vmem:[#allocation2 + $0x80] sm:$0xff]  ;;  %v386_v3 = vld [vmem:[#allocation2 + $0x88] sm:$0xff] }
  0x76   : > { %v576_v5 = vunpack.c.l.b16 %v467_v56  ;;  %v577_v6 = vunpack.c.l.b16 %v468_v58  ;;  %v440_v7 = vpack.c.bf16 %v385_v2, %v385_v2  ;;  %v441_v8 = vpack.c.bf16 %v386_v3, %v386_v3  ;;  %v387_v9 = vld [vmem:[#allocation2 + $0x90] sm:$0xff]  ;;  %v2638_v56 = vld [vmem:[%s2886_s30 + $0x38] sm:$0xff]   ;;  %v2639_v2 = vld [vmem:[%s2886_s30 + $0x40] sm:$0xff]  }
  0x77   : > { %v578_v13 = vunpack.c.l.b16 %v469_v1  ;;  %v388_v15 = vld [vmem:[#allocation2 + $0x98] sm:$0xff]  ;;  %v442_v16 = vpack.c.bf16 %v387_v9, %v387_v9  ;;  %v2595_v1 = vunpack.c.h.bf16 %v3129_v4  ;;  %v2630_v3 = vunpack.c.l.bf16 %v2646_v47 }
  0x78   : > { %956 = vrot.lane.b32.xlu1 %v903_v42, %s2791_s5  ;;  %v3134_v21 = vpack.c.b16 %v576_v5, %v575_v0  ;;  %v549_v22 = vunpack.c.l.b16 %v440_v7  ;;  %v550_v23 = vunpack.c.l.b16 %v441_v8  ;;  %v443_v26 = vpack.c.bf16 %v388_v15, %v388_v15  ;;  %v415_v43 = vld [vmem:[#allocation2 + $0x170] sm:$0xff]  ;;  %v416_v46 = vld [vmem:[#allocation2 + $0x178] sm:$0xff]  ;;  %v389_v15 = vld [vmem:[#allocation2 + $0xa0] sm:$0xff] }
  0x79   : > { %984 = vrot.lane.b32.xlu2 %v931_v49, %s2791_s5  ;;  %v3136_v27 = vpack.c.b16 %v578_v13, %v577_v6  ;;  %v551_v37 = vunpack.c.l.b16 %v442_v16  ;;  %v677_v42 = vsel %vm617_vm1, %v672_v28, %v676_v34  ;;  %v470_v54 = vpack.c.bf16 %v415_v43, %v415_v43  ;;  %350 = vst.msk [vmem:[#allocation2 + $0xb1] sm:$0xff] %vm275_vm0, %v2595_v1  ;;  %v390_v16 = vld [vmem:[#allocation2 + $0xa8] sm:$0xff] }
  0x7a   : > { %v786_v29 = vshll.u32 %v3134_v21, 16  ;;  %v790_v36 = vshrl.u32 %v3134_v21, 16  ;;  %v3151_v38 = vpack.c.b16 %v550_v23, %v549_v22  ;;  %v552_v40 = vunpack.c.l.b16 %v443_v26  ;;  %367 = vst.msk [vmem:[#allocation2 + $0x181] sm:$0xff] %vm275_vm0, %v2630_v3 }
  0x7b   : > { %v794_v18 = vshll.u32 %v3136_v27, 16  ;;  %v934_v57 = vrot.slane %v3134_v21, 1  ;;  %v2631_v5 = vunpack.c.h.bf16 %v2646_v47  ;;  %v2598_v6 = vunpack.c.l.bf16 %v2638_v56 }
  0x7c   : > { %986 = vrot.lane.b32.xlu0 %v933_v52, %s2791_s5  ;;  %v788_v45 = vrot.slane %v786_v29, 1  ;;  %v3156_v51 = vpack.c.b16 %v552_v40, %v551_v37  ;;  %v682_v25 = vshll.u32 %v3151_v38, 16  ;;  %v471_v52 = vpack.c.bf16 %v416_v46, %v416_v46 }
  0x7d   : > { %v796_v50 = vrot.slane %v794_v18, 1  ;;  %v686_v58 = vshrl.u32 %v3151_v38, 16  ;;  %v579_v7 = vunpack.c.l.b16 %v470_v54  ;;  %v680_v9 = vor.u32 %v678_v55, %v676_v34  ;;  %368 = vst.msk [vmem:[#allocation2 + $0x189] sm:$0xff] %vm275_vm0, %v2631_v5  ;;  %v2640_v5 = vld [vmem:[%s2886_s30 + $0x48] sm:$0xff]  }
  0x7e   : > { %v792_v49 = vor.u32 %v790_v36, %v788_v45  ;;  %v789_v53 = vsel %vm617_vm1, %v784_v32, %v788_v45  ;;  %v684_v63 = vrot.slane %v682_v25, 1  ;;  %v690_v0 = vshll.u32 %v3156_v51, 16  ;;  %351 = vst.msk [vmem:[#allocation2 + $0xc1] sm:$0xff] %vm275_vm0, %v2598_v6 }
  0x7f   : > { %v580_v8 = vunpack.c.l.b16 %v471_v52  ;;  %v2599_v13 = vunpack.c.h.bf16 %v2638_v56  ;;  %v2602_v17 = vunpack.c.l.bf16 %v2639_v2  ;;  %v935_v4 = vsel %vm892_vm2, %v932_v44, %v934_v57 }
  0x80   : > { %876 = vrot.lane.b32.xlu1 %v781_v61, %s2790_s4  ;;  %v797_v61 = vsel %vm617_vm1, %v792_v49, %v796_v50  ;;  %v688_v22 = vor.u32 %v686_v58, %v684_v63  ;;  %v3177_v23 = vrot.slane %v690_v0, 1  ;;  %v685_v28 = vsel %vm617_vm1, %v680_v9, %v684_v63  ;;  %v392_v49 = vld [vmem:[#allocation2 + $0xb8] sm:$0xff] }
  0x81   : > { %958 = vrot.lane.b32.xlu2 %v905_v30, %s2791_s5  ;;  %v3181_v26 = vpack.c.b16 %v580_v8, %v579_v7  ;;  %v444_v29 = vpack.c.bf16 %v389_v15, %v389_v15  ;;  %v445_v30 = vpack.c.bf16 %v390_v16, %v390_v16  ;;  %352 = vst.msk [vmem:[#allocation2 + $0xc9] sm:$0xff] %vm275_vm0, %v2599_v13  ;;  %v908_v44 = vrot.slane %v3151_v38, 1  ;;  %v417_v45 = vld [vmem:[#allocation2 + $0x180] sm:$0xff] }
  0x82   : > { %353 = vst.msk [vmem:[#allocation2 + $0xd9] sm:$0xff] %vm275_vm0, %v2602_v17  ;;  %v693_v31 = vsel %vm617_vm1, %v688_v22, %v3177_v23  ;;  %v798_v34 = vshrl.u32 %v3136_v27, 16  ;;  %v2603_v18 = vunpack.c.h.bf16 %v2639_v2  ;;  %v936_v40 = vrot.slane %v3136_v27, 1 }
  0x83   : > { %v553_v36 = vunpack.c.l.b16 %v444_v29  ;;  %v554_v37 = vunpack.c.l.b16 %v445_v30  ;;  %v938_v32 = vrot.slane %v3181_v26, 1  ;;  %v909_v46 = vsel %vm892_vm2, %v906_v12, %v908_v44 }
  0x84   : > { %960 = vrot.lane.b32.xlu0 %v907_v35, %s2791_s5  ;;  %v802_v35 = vshll.u32 %v3181_v26, 16  ;;  %v418_v43 = vld [vmem:[#allocation2 + $0x188] sm:$0xff]  ;;  %v472_v25 = vpack.c.bf16 %v417_v45, %v417_v45  ;;  %354 = vst.msk [vmem:[#allocation2 + $0xe1] sm:$0xff] %vm275_vm0, %v2603_v18  ;;  %v800_v54 = vor.u32 %v798_v34, %v796_v50  ;;  %v937_v58 = vsel %vm892_vm2, %v934_v57, %v936_v40 }
  0x85   : > { %v393_v52 = vld [vmem:[#allocation2 + $0xc0] sm:$0xff]  ;;  %v3200_v56 = vpack.c.b16 %v554_v37, %v553_v36  ;;  %v939_v12 = vsel %vm892_vm2, %v936_v40, %v938_v32  ;;  %v447_v63 = vpack.c.bf16 %v392_v49, %v392_v49  ;;  %v910_v6 = vrot.slane %v3156_v51, 1 }
  0x86   : > { %v804_v47 = vrot.slane %v802_v35, 1  ;;  %v581_v0 = vunpack.c.l.b16 %v472_v25  ;;  %v448_v3 = vpack.c.bf16 %v393_v52, %v393_v52  ;;  %v694_v7 = vshrl.u32 %v3156_v51, 16 }
  0x87   : > { %v912_v9 = vrot.slane %v3200_v56, 1  ;;  %v698_v13 = vshll.u32 %v3200_v56, 16  ;;  %v556_v16 = vunpack.c.l.b16 %v447_v63  ;;  %v2607_v22 = vunpack.c.h.bf16 %v2640_v5 }
  0x88   : > { %850 = vrot.lane.b32.xlu1 %v677_v42, %s2790_s4  ;;  %v391_v42 = vld [vmem:[#allocation2 + $0xb0] sm:$0xff]  ;;  %v394_v55 = vld [vmem:[#allocation2 + $0xc8] sm:$0xff]  ;;  %v805_v8 = vsel %vm617_vm1, %v800_v54, %v804_v47  ;;  %v557_v30 = vunpack.c.l.b16 %v448_v3  ;;  %v911_v34 = vsel %vm892_vm2, %v908_v44, %v910_v6  ;;  %v806_v35 = vshrl.u32 %v3181_v26, 16 }
  0x89   : > { %878 = vrot.lane.b32.xlu2 %v789_v53, %s2790_s4  ;;  %v473_v53 = vpack.c.bf16 %v418_v43, %v418_v43  ;;  %v395_v2 = vld [vmem:[#allocation2 + $0xd0] sm:$0xff]  ;;  %v449_v50 = vpack.c.bf16 %v394_v55, %v394_v55  ;;  %v396_v57 = vld [vmem:[#allocation2 + $0xd8] sm:$0xff]  ;;  %356 = vst.msk [vmem:[#allocation2 + $0xf9] sm:$0xff] %vm275_vm0, %v2607_v22  ;;  %v913_v37 = vsel %vm892_vm2, %v910_v6, %v912_v9  ;;  %v700_v40 = vrot.slane %v698_v13, 1 }
  0x8a   : > { %v450_v17 = vpack.c.bf16 %v395_v2, %v395_v2  ;;  %v451_v29 = vpack.c.bf16 %v396_v57, %v396_v57  ;;  %v696_v45 = vor.u32 %v694_v7, %v3177_v23  ;;  %v808_v44 = vor.u32 %v806_v35, %v804_v47 }
  0x8b   : > { %v582_v1 = vunpack.c.l.b16 %v473_v53  ;;  %v397_v25 = vld [vmem:[#allocation2 + $0xe0] sm:$0xff]  ;;  %v398_v53 = vld [vmem:[#allocation2 + $0xe8] sm:$0xff]  ;;  %v702_v63 = vshrl.u32 %v3200_v56, 16 }
  0x8c   : > { %880 = vrot.lane.b32.xlu0 %v797_v61, %s2790_s4  ;;  %v446_v61 = vpack.c.bf16 %v391_v42, %v391_v42  ;;  %v559_v42 = vunpack.c.l.b16 %v450_v17  ;;  %v560_v43 = vunpack.c.l.b16 %v451_v29  ;;  %v701_v23 = vsel %vm617_vm1, %v696_v45, %v700_v40  ;;  %v419_v29 = vld [vmem:[#allocation2 + $0x190] sm:$0xff] }
  0x8e   : > { %v555_v15 = vunpack.c.l.b16 %v446_v61  ;;  %v3235_v52 = vpack.c.b16 %v560_v43, %v559_v42  ;;  %v453_v61 = vpack.c.bf16 %v398_v53, %v398_v53 }
  0x90   : > { %988 = vrot.lane.b32.xlu1 %v935_v4, %s2791_s5  ;;  %v2606_v4 = vunpack.c.l.bf16 %v2640_v5  ;;  %v3225_v18 = vpack.c.b16 %v556_v16, %v555_v15  ;;  %v722_v6 = vshll.u32 %v3235_v52, 16  ;;  %v562_v15 = vunpack.c.l.b16 %v453_v61 }
  0x91   : > { %852 = vrot.lane.b32.xlu2 %v685_v28, %s2790_s4  ;;  %v3215_v28 = vpack.c.b16 %v582_v1, %v581_v0 }
  0x92   : > { %355 = vst.msk [vmem:[#allocation2 + $0xf1] sm:$0xff] %vm275_vm0, %v2606_v4  ;;  %v914_v54 = vrot.slane %v3225_v18, 1  ;;  %v706_v2 = vshll.u32 %v3225_v18, 16  ;;  %v710_v16 = vshrl.u32 %v3225_v18, 16  ;;  %v724_v35 = vrot.slane %v722_v6, 1  ;;  %v422_v6 = vld [vmem:[#allocation2 + $0x1a8] sm:$0xff] }
  0x93   : > { %v810_v36 = vshll.u32 %v3215_v28, 16  ;;  %v940_v1 = vrot.slane %v3215_v28, 1 }
  0x94   : > { %854 = vrot.lane.b32.xlu0 %v693_v31, %s2790_s4  ;;  %v558_v31 = vunpack.c.l.b16 %v449_v50  ;;  %v915_v0 = vsel %vm892_vm2, %v912_v9, %v914_v54  ;;  %v704_v9 = vor.u32 %v702_v63, %v700_v40  ;;  %v474_v40 = vpack.c.bf16 %v419_v29, %v419_v29 }
  0x95   : > { %v3230_v49 = vrot.slane %v810_v36, 1  ;;  %v708_v36 = vrot.slane %v706_v2, 1 }
  0x97   : > { %v813_v47 = vsel %vm617_vm1, %v808_v44, %v3230_v49  ;;  %v709_v45 = vsel %vm617_vm1, %v704_v9, %v708_v36  ;;  %v712_v53 = vor.u32 %v710_v16, %v708_v36  ;;  %v401_v9 = vld [vmem:[#allocation2 + $0x100] sm:$0xff] }
  0x98   : > { %962 = vrot.lane.b32.xlu1 %v909_v46, %s2791_s5  ;;  %v3227_v46 = vpack.c.b16 %v558_v31, %v557_v30  ;;  %v420_v30 = vld [vmem:[#allocation2 + $0x198] sm:$0xff]  ;;  %v941_v31 = vsel %vm892_vm2, %v938_v32, %v940_v1  ;;  %v456_v36 = vpack.c.bf16 %v401_v9, %v401_v9 }
  0x99   : > { %990 = vrot.lane.b32.xlu2 %v937_v58, %s2791_s5  ;;  %v452_v58 = vpack.c.bf16 %v397_v25, %v397_v25  ;;  %v399_v7 = vld [vmem:[#allocation2 + $0xf0] sm:$0xff]  ;;  %v400_v57 = vld [vmem:[#allocation2 + $0xf8] sm:$0xff]  ;;  %v475_v42 = vpack.c.bf16 %v420_v30, %v420_v30  ;;  %v726_v30 = vshrl.u32 %v3235_v52, 16 }
  0x9a   : > { %v714_v55 = vshll.u32 %v3227_v46, 16  ;;  %v718_v5 = vshrl.u32 %v3227_v46, 16  ;;  %v454_v17 = vpack.c.bf16 %v399_v7, %v399_v7  ;;  %v455_v4 = vpack.c.bf16 %v400_v57, %v400_v57 }
  0x9b   : > { %v561_v13 = vunpack.c.l.b16 %v452_v58  ;;  %v583_v58 = vunpack.c.l.b16 %v474_v40  ;;  %v584_v61 = vunpack.c.l.b16 %v475_v42 }
  0x9c   : > { %992 = vrot.lane.b32.xlu0 %v939_v12, %s2791_s5  ;;  %v2641_v12 = vld [vmem:[%s2886_s30 + $0x50] sm:$0xff]   ;;  %v716_v50 = vrot.slane %v714_v55, 1  ;;  %v563_v43 = vunpack.c.l.b16 %v454_v17  ;;  %v564_v44 = vunpack.c.l.b16 %v455_v4 }
  0x9d   : > { %v2610_v3 = vunpack.c.l.bf16 %v2641_v12  ;;  %v3287_v17 = vpack.c.b16 %v584_v61, %v583_v58  ;;  %v728_v58 = vor.u32 %v726_v30, %v724_v35 }
  0x9e   : > { %v3276_v63 = vpack.c.b16 %v564_v44, %v563_v43  ;;  %v717_v2 = vsel %vm617_vm1, %v712_v53, %v716_v50  ;;  %v814_v53 = vshrl.u32 %v3215_v28, 16 }
  0x9f   : > { %357 = vst.msk [vmem:[#allocation2 + $0x109] sm:$0xff] %vm275_vm0, %v2610_v3  ;;  %v916_v3 = vrot.slane %v3227_v46, 1 }
  0xa0   : > { %882 = vrot.lane.b32.xlu1 %v805_v8, %s2790_s4  ;;  %v2611_v8 = vunpack.c.h.bf16 %v2641_v12  ;;  %v2473_v12 = vld [vmem:[%s4084_s1] sm:$0xf]  ;;  %v738_v29 = vshll.u32 %v3276_v63, 16 }
  0xa1   : > { %964 = vrot.lane.b32.xlu2 %v911_v34, %s2791_s5  ;;  %v720_v34 = vor.u32 %v718_v5, %v716_v50  ;;  %v421_v5 = vld [vmem:[#allocation2 + $0x1a0] sm:$0xff]  ;;  %v917_v4 = vsel %vm892_vm2, %v914_v54, %v916_v3  ;;  %v2566_v54 = vld [vmem:[%s4084_s1 + $0x8] sm:$0x30] }
  0xa2   : > { %358 = vst.msk [vmem:[#allocation2 + $0x111] sm:$0xff] %vm275_vm0, %v2611_v8  ;;  %v839_v22 = vpop.permute.xlu0 %838  ;;  %v3308_v61 = vrot.slane %v738_v29, 1 }
  0xa3   : > { %v725_v25 = vsel %vm617_vm1, %v720_v34, %v724_v35  ;;  %v1003_v8 = vsel %vm275_vm0, %v2909_v11, %v839_v22  ;;  %v476_v11 = vpack.c.bf16 %v421_v5, %v421_v5  ;;  %v477_v22 = vpack.c.bf16 %v422_v6, %v422_v6  ;;  %v2503_v34 = vld [vmem:[%s4084_s1 + $0x8] sm:$0xf]  ;;  %v2533_v6 = vld [vmem:[%s4084_s1 + $0x10] sm:$0xf]  ;;  %v2567_v35 = vld [vmem:[%s4084_s1 + $0x10] sm:$0x30] }
  0xa4   : > { %966 = vrot.lane.b32.xlu0 %v913_v37, %s2791_s5  ;;  %v3260_v37 = vpack.c.b16 %v562_v15, %v561_v13  ;;  %v2504_v42 = vor.u32 %v2566_v54, %v2503_v34 }
  0xa6   : > { %v920_v32 = vrot.slane %v3260_v37, 1  ;;  %v730_v55 = vshll.u32 %v3260_v37, 16  ;;  %v734_v57 = vshrl.u32 %v3260_v37, 16  ;;  %v402_v16 = vld [vmem:[#allocation2 + $0x108] sm:$0xff] }
  0xa8   : > { %856 = vrot.lane.b32.xlu1 %v701_v23, %s2790_s4  ;;  %v918_v23 = vrot.slane %v3235_v52, 1  ;;  %v732_v50 = vrot.slane %v730_v55, 1  ;;  %v818_v55 = vshll.u32 %v3287_v17, 16 }
  0xa9   : > { %884 = vrot.lane.b32.xlu2 %v813_v47, %s2790_s4  ;;  %v2565_v47 = vld [vmem:[%s4084_s1] sm:$0x30]  ;;  %v403_v43 = vld [vmem:[#allocation2 + $0x110] sm:$0xff]  ;;  %v404_v44 = vld [vmem:[#allocation2 + $0x118] sm:$0xff] }
  0xaa   : > { %v921_v7 = vsel %vm892_vm2, %v918_v23, %v920_v32  ;;  %v949_v15 = vpop.permute.xlu0 %948  ;;  %v919_v40 = vsel %vm892_vm2, %v916_v3, %v918_v23  ;;  %v1504_v23 = vsel %vm1167_vm3, %v2504_v42, 0  ;;  %v565_v3 = vunpack.c.l.b16 %v456_v36 }
  0xab   : > { %1513 = vmatpush.bf16.msra.mxu1 %v1504_v23  ;;  %v820_v9 = vrot.slane %v818_v55, 1  ;;  %v822_v36 = vshrl.u32 %v3287_v17, 16 }
  0xac   : > { %968 = vrot.lane.b32.xlu0 %v915_v0, %s2791_s5  ;;  %v2474_v0 = vor.u32 %v2565_v47, %v2473_v12  ;;  %v585_v12 = vunpack.c.l.b16 %v476_v11  ;;  %v586_v47 = vunpack.c.l.b16 %v477_v22 }
  0xae   : > { %v1169_v13 = vsel %vm1167_vm3, %v2474_v0, 0  ;;  %v458_v0 = vpack.c.bf16 %v403_v43, %v403_v43 }
  0xaf   : > { %1178 = vmatpush.bf16.msra.mxu0 %v1169_v13  ;;  %2647 = vmatpush.bf16.msra.mxu3 %v1169_v13 }
  0xb0   : > { %994 = vrot.lane.b32.xlu1 %v941_v31, %s2791_s5  ;;  %v1058_v31 = vsel %vm1056_vm4, %v1003_v8, %v949_v15  ;;  %v733_v8 = vsel %vm617_vm1, %v728_v58, %v732_v50  ;;  %v816_v15 = vor.u32 %v814_v53, %v3230_v49  ;;  %v567_v29 = vunpack.c.l.b16 %v458_v0 }
  0xb1   : > { %858 = vrot.lane.b32.xlu2 %v709_v45, %s2790_s4  ;;  %v457_v45 = vpack.c.bf16 %v402_v16, %v402_v16  ;;  %v942_v49 = vrot.slane %v3287_v17, 1 }
  0xb2   : > { %2475 = vmatmul.msk.bf16.vlgmr.msra.gmra.mxu0 %vm1118_vm5, %v1058_v31 }
  0xb3   : > { %v566_v5 = vunpack.c.l.b16 %v457_v45  ;;  %2648 = vmatpush.bf16.msrb.mxu3 %v1504_v23  ;;  %v943_v54 = vsel %vm892_vm2, %v940_v1, %v942_v49  ;;  %v824_v1 = vor.u32 %v822_v36, %v820_v9 }
  0xb4   : > { %862 = vrot.lane.b32.xlu0 %v725_v25, %s2790_s4  ;;  %v736_v25 = vor.u32 %v734_v57, %v732_v50  ;;  %v821_v50 = vsel %vm617_vm1, %v816_v15, %v820_v9 }
  0xb5   : > { %v3327_v22 = vpack.c.b16 %v566_v5, %v565_v3  ;;  %v922_v3 = vrot.slane %v3276_v63, 1 }
  0xb6   : > { %v741_v13 = vsel %vm617_vm1, %v736_v25, %v3308_v61 }
  0xb7   : > { %v746_v34 = vshll.u32 %v3327_v22, 16  ;;  %v924_v5 = vrot.slane %v3327_v22, 1 }
  0xb8   : > { %860 = vrot.lane.b32.xlu1 %v717_v2, %s2790_s4  ;;  %v459_v2 = vpack.c.bf16 %v404_v44, %v404_v44  ;;  %v750_v44 = vshrl.u32 %v3327_v22, 16 }
  0xb9   : > { %970 = vrot.lane.b32.xlu2 %v917_v4, %s2791_s5  ;;  %v3325_v4 = vpack.c.b16 %v586_v47, %v585_v12  ;;  %v3347_v43 = vrot.slane %v746_v34, 1 }
  0xba   : > { %v568_v11 = vunpack.c.l.b16 %v459_v2 }
  0xbb   : > { %v951_v57 = vpop.permute.xlu2 %950  ;;  %v944_v30 = vrot.slane %v3325_v4, 1  ;;  %v826_v45 = vshll.u32 %v3325_v4, 16  ;;  %v752_v55 = vor.u32 %v750_v44, %v3347_v43 }
  0xbc   : > { %974 = vrot.lane.b32.xlu0 %v921_v7, %s2791_s5  ;;  %v2534_v7 = vor.u32 %v2567_v35, %v2533_v6  ;;  %v3335_v31 = vpack.c.b16 %v568_v11, %v567_v29 }
  0xbd   : > { %v3352_v53 = vrot.slane %v826_v45, 1 }
  0xbe   : > { %v3323_v16 = vsel %vm1167_vm3, %v2534_v7, 0  ;;  %v754_v25 = vshll.u32 %v3335_v31, 16  ;;  %v926_v35 = vrot.slane %v3335_v31, 1 }
  0xbf   : > { %1803 = vmatpush.bf16.msra.mxu2 %v3323_v16  ;;  %v829_v12 = vsel %vm617_vm1, %v824_v1, %v3352_v53 }
  0xc0   : > { %972 = vrot.lane.b32.xlu1 %v919_v40, %s2791_s5  ;;  %v945_v40 = vsel %vm892_vm2, %v942_v49, %v944_v30  ;;  %v756_v58 = vrot.slane %v754_v25, 1 }
  0xc1   : > { %864 = vrot.lane.b32.xlu2 %v733_v8, %s2790_s4  ;;  %v925_v8 = vsel %vm892_vm2, %v922_v3, %v924_v5 }
  0xc2   : > { %v757_v47 = vsel %vm617_vm1, %v752_v55, %v756_v58 }
  0xc3   : > { %v953_v42 = vpop.permute.xlu2 %952 }
  0xc4   : > { %866 = vrot.lane.b32.xlu0 %v741_v13, %s2790_s4  ;;  %v929_v13 = vsel %vm892_vm2, %v926_v35, %v928_v39 }
  0xc8   : > { %886 = vrot.lane.b32.xlu1 %v821_v50, %s2790_s4 }
  0xc9   : > { %996 = vrot.lane.b32.xlu2 %v943_v54, %s2791_s5 }
  0xcb   : > { %v847_v2 = vpop.permute.xlu2 %846 }
  0xcc   : > { %998 = vrot.lane.b32.xlu0 %v945_v40, %s2791_s5  ;;  %v1011_v25 = vsel %vm275_vm0, %v3043_v14, %v847_v2 }
  0xd1   : > { %888 = vrot.lane.b32.xlu2 %v829_v12, %s2790_s4 }
  0xd2   : > { %v841_v23 = vpop.permute.xlu1 %840 }
  0xd3   : > { %v1005_v0 = vsel %vm275_vm0, %v2927_v19, %v841_v23  ;;  %v758_v19 = vshrl.u32 %v3335_v31, 16  ;;  %v985_v49 = vpop.permute.xlu2 %984 }
  0xd4   : > { %v1060_v6 = vsel %vm1056_vm4, %v1005_v0, %v951_v57  ;;  %870 = vrot.lane.b32.xlu0 %v757_v47, %s2790_s4  ;;  %v742_v0 = vshrl.u32 %v3276_v63, 16 }
  0xd5   : > { %2476 = vmatmul.msk.bf16.gmra.mxu0 %vm1118_vm5, %v1060_v6  ;;  %v760_v9 = vor.u32 %v758_v19, %v756_v58  ;;  %v1377_v11 = vrot.slane %v1060_v6, 4 }
  0xd6   : > { %v845_v7 = vpop.permute.xlu0 %844  ;;  %v744_v2 = vor.u32 %v742_v0, %v3308_v61 }
  0xd7   : > { %v765_v36 = vsel %vm617_vm1, %v760_v9, %v3061_v41 }
  0xd9   : > { %978 = vrot.lane.b32.xlu2 %v925_v8, %s2791_s5 }
  0xda   : > { %v843_v57 = vpop.permute.xlu1 %842 }
  0xdb   : > { %v1007_v15 = vsel %vm275_vm0, %v3036_v62, %v843_v57  ;;  %v1009_v62 = vsel %vm275_vm0, %v3040_v10, %v845_v7  ;;  %v959_v14 = vpop.permute.xlu2 %958  ;;  %v749_v7 = vsel %vm617_vm1, %v744_v2, %v3347_v43 }
  0xdc   : > { %v1062_v29 = vsel %vm1056_vm4, %v1007_v15, %v953_v42  ;;  %982 = vrot.lane.b32.xlu0 %v929_v13, %s2791_s5 }
  0xdd   : > { %v1378_v50 = vrot.slane %v1062_v29, 4 }
  0xde   : > { %v875_v34 = vpop.permute.xlu0 %874 }
  0xdf   : > { %v1379_v54 = vsel %vm1376_vm6, %v1377_v11, %v1378_v50  ;;  %v1039_v39 = vsel %vm275_vm0, %v3048_v24, %v875_v34 }
  0xe0   : > { %2505 = vmatmul.msk.bf16.vlgmr.msra.gmra.mxu1 %vm1118_vm5, %v1379_v54  ;;  %v3391_v45 = vsel %vm1056_vm4, %v1039_v39, %v985_v49 }
  0xe1   : > { %2493 = vmatmul.msk.bf16.vlgmr.msra.gmra.mxu3 %vm1118_vm5, %v3391_v45  ;;  %872 = vrot.lane.b32.xlu2 %v765_v36, %s2790_s4 }
  0xe2   : > { %v955_v40 = vpop.permute.xlu1 %954  ;;  %2649 = vmatpush.bf16.msra.mxu3 %v3323_v16  ;;  %v923_v16 = vsel %vm892_vm2, %v920_v32, %v922_v3 }
  0xe3   : > { %v1064_v24 = vsel %vm1056_vm4, %v1009_v62, %v955_v40  ;;  %976 = vrot.lane.b32.xlu1 %v923_v16, %s2791_s5 }
  0xe4   : > { %2535 = vmatmul.msk.bf16.vlgmr.msra.gmra.mxu2 %vm1118_vm5, %v1064_v24  ;;  %v1380_v10 = vrot.slane %v1064_v24, 4 }
  0xe5   : > { %2477 = vmatmul.msk.bf16.gmra.mxu0 %vm1118_vm5, %v1062_v29  ;;  %v927_v29 = vsel %vm892_vm2, %v924_v5, %v926_v35 }
  0xe6   : > { %v849_v41 = vpop.permute.xlu0 %848  ;;  %v1381_v44 = vsel %vm1376_vm6, %v1378_v50, %v1380_v10 }
  0xe7   : > { %v1013_v6 = vsel %vm275_vm0, %v3069_v59, %v849_v41 }
  0xe8   : > { %v1068_v13 = vsel %vm1056_vm4, %v1013_v6, %v959_v14 }
  0xe9   : > { %v1384_v43 = vrot.slane %v1068_v13, 4 }
  0xea   : > { %v957_v42 = vpop.permute.xlu1 %956 }
  0xeb   : > { %v1066_v12 = vsel %vm1056_vm4, %v1011_v25, %v957_v42  ;;  %868 = vrot.lane.b32.xlu1 %v749_v7, %s2790_s4 }
  0xec   : > { %v1382_v23 = vrot.slane %v1066_v12, 4 }
  0xee   : > { %v987_v1 = vpop.permute.xlu0 %986  ;;  %v1383_v3 = vsel %vm1376_vm6, %v1380_v10, %v1382_v23 }
  0xf0   : > { %2506 = vmatmul.msk.bf16.gmra.mxu1 %vm1118_vm5, %v1381_v44 }
  0xf2   : > { %v877_v55 = vpop.permute.xlu1 %876 }
  0xf3   : > { %v1041_v58 = vsel %vm275_vm0, %v3053_v33, %v877_v55  ;;  %v879_v33 = vpop.permute.xlu2 %878  ;;  %980 = vrot.lane.b32.xlu1 %v927_v29, %s2791_s5 }
  0xf4   : > { %2536 = vmatmul.msk.bf16.gmra.mxu2 %vm1118_vm5, %v1066_v12  ;;  %v3413_v47 = vsel %vm1056_vm4, %v1041_v58, %v987_v1  ;;  %v1043_v8 = vsel %vm275_vm0, %v3088_v20, %v879_v33  ;;  %v1385_v20 = vsel %vm1376_vm6, %v1382_v23, %v1384_v43 }
  0xf5   : > { %2494 = vmatmul.msk.bf16.gmra.mxu3 %vm1118_vm5, %v3413_v47  ;;  %2478 = vmatmul.msk.bf16.gmra.mxu0 %vm1118_vm5, %v1064_v24  ;;  %v1412_v23 = vrot.slane %v3413_v47, 4 }
  0xf6   : > { %v961_v57 = vpop.permute.xlu0 %960 }
  0xfa   : > { %v851_v32 = vpop.permute.xlu1 %850 }
  0xfb   : > { %v853_v59 = vpop.permute.xlu2 %852  ;;  %v1015_v9 = vsel %vm275_vm0, %v3071_v60, %v851_v32 }
  0xfc   : > { %v1070_v49 = vsel %vm1056_vm4, %v1015_v9, %v961_v57  ;;  %v1017_v39 = vsel %vm275_vm0, %v3113_v48, %v853_v59 }
  0xfd   : > { %v1386_v35 = vrot.slane %v1070_v49, 4 }
  0xfe   : > { %v881_v15 = vpop.permute.xlu0 %880 }
  0xff   : > { %v1045_v11 = vsel %vm275_vm0, %v3134_v21, %v881_v15  ;;  %v1387_v21 = vsel %vm1376_vm6, %v1384_v43, %v1386_v35  ;;  %v423_v15 = vld [vmem:[#allocation2 + $0x1b0] sm:$0xff] }
 0x100   : > { %2507 = vmatmul.msk.bf16.gmra.mxu1 %vm1118_vm5, %v1383_v3  ;;  %v478_v9 = vpack.c.bf16 %v423_v15, %v423_v15 }
 0x102   : > { %v989_v19 = vpop.permute.xlu1 %988 }
 0x103   : > { %v3432_v61 = vsel %vm1056_vm4, %v1043_v8, %v989_v19  ;;  %v991_v50 = vpop.permute.xlu2 %990 }
 0x104   : > { %2537 = vmatmul.msk.bf16.gmra.mxu2 %vm1118_vm5, %v1068_v13  ;;  %v3452_v60 = vsel %vm1056_vm4, %v1045_v11, %v991_v50  ;;  %v1414_v14 = vrot.slane %v3432_v61, 4  ;;  %v615_v11 = vunpack.c.l.b16 %v478_v9 }
 0x105   : > { %2495 = vmatmul.msk.bf16.gmra.mxu3 %vm1118_vm5, %v3432_v61  ;;  %2479 = vmatmul.msk.bf16.gmra.mxu0 %vm1118_vm5, %v1066_v12  ;;  %v1416_v7 = vrot.slane %v3452_v60, 4 }
 0x106   : > { %v855_v5 = vpop.permute.xlu0 %854  ;;  %v1415_v33 = vsel %vm1376_vm6, %v1412_v23, %v1414_v14 }
 0x107   : > { %v1417_v59 = vsel %vm1376_vm6, %v1414_v14, %v1416_v7 }
 0x10a   : > { %v963_v34 = vpop.permute.xlu1 %962 }
 0x10b   : > { %v1072_v40 = vsel %vm1056_vm4, %v1017_v39, %v963_v34  ;;  %v965_v41 = vpop.permute.xlu2 %964 }
 0x10c   : > { %v1388_v42 = vrot.slane %v1072_v40, 4 }
 0x10e   : > { %v993_v62 = vpop.permute.xlu0 %992  ;;  %v1389_v10 = vsel %vm1376_vm6, %v1386_v35, %v1388_v42 }
 0x110   : > { %2508 = vmatmul.msk.bf16.gmra.mxu1 %vm1118_vm5, %v1385_v20 }
 0x112   : > { %v883_v54 = vpop.permute.xlu1 %882 }
 0x113   : > { %v1047_v36 = vsel %vm275_vm0, %v3136_v27, %v883_v54  ;;  %v1019_v27 = vsel %vm275_vm0, %v3151_v38, %v855_v5  ;;  %v885_v44 = vpop.permute.xlu2 %884  ;;  %v3513_v5 = vpack.c.b16 %v615_v11, %v615_v11 }
 0x114   : > { %2538 = vmatmul.msk.bf16.gmra.mxu2 %vm1118_vm5, %v1070_v49  ;;  %v3466_v24 = vsel %vm1056_vm4, %v1047_v36, %v993_v62  ;;  %v1049_v25 = vsel %vm275_vm0, %v3181_v26, %v885_v44  ;;  %v1074_v1 = vsel %vm1056_vm4, %v1019_v27, %v965_v41 }
 0x115   : > { %2496 = vmatmul.msk.bf16.gmra.mxu3 %vm1118_vm5, %v3452_v60  ;;  %2480 = vmatmul.msk.bf16.gmra.mxu0 %vm1118_vm5, %v1068_v13  ;;  %v1390_v58 = vrot.slane %v1074_v1, 4  ;;  %v1418_v35 = vrot.slane %v3466_v24, 4  ;;  %v834_v39 = vshll.u32 %v3513_v5, 16 }
 0x116   : > { %v967_v0 = vpop.permute.xlu0 %966 }
 0x117   : > { %v1391_v12 = vsel %vm1376_vm6, %v1388_v42, %v1390_v58  ;;  %v836_v42 = vrot.slane %v834_v39, 1 }
 0x11a   : > { %v857_v48 = vpop.permute.xlu1 %856 }
 0x11b   : > { %v1021_v32 = vsel %vm275_vm0, %v3156_v51, %v857_v48  ;;  %v859_v3 = vpop.permute.xlu2 %858 }
 0x11c   : > { %v1076_v2 = vsel %vm1056_vm4, %v1021_v32, %v967_v0  ;;  %v1023_v8 = vsel %vm275_vm0, %v3200_v56, %v859_v3 }
 0x11d   : > { %v1392_v51 = vrot.slane %v1076_v2, 4 }
 0x11e   : > { %v969_v19 = vpop.permute.xlu0 %968 }
 0x11f   : > { %v1393_v6 = vsel %vm1376_vm6, %v1390_v58, %v1392_v51  ;;  %v1078_v57 = vsel %vm1056_vm4, %v1023_v8, %v969_v19 }
 0x120   : > { %2509 = vmatmul.msk.bf16.gmra.mxu1 %vm1118_vm5, %v1387_v21  ;;  %v1394_v20 = vrot.slane %v1078_v57, 4  ;;  %v830_v21 = vshrl.u32 %v3325_v4, 16 }
 0x122   : > { %v995_v16 = vpop.permute.xlu1 %994  ;;  %v1395_v34 = vsel %vm1376_vm6, %v1392_v51, %v1394_v20  ;;  %v832_v48 = vor.u32 %v830_v21, %v3352_v53 }
 0x123   : > { %v3480_v55 = vsel %vm1056_vm4, %v1049_v25, %v995_v16  ;;  %v971_v36 = vpop.permute.xlu2 %970 }
 0x124   : > { %2539 = vmatmul.msk.bf16.gmra.mxu2 %vm1118_vm5, %v1072_v40  ;;  %v837_v44 = vsel %vm617_vm1, %v832_v48, %v836_v42 }
 0x125   : > { %2497 = vmatmul.msk.bf16.gmra.mxu3 %vm1118_vm5, %v3466_v24  ;;  %2481 = vmatmul.msk.bf16.gmra.mxu0 %vm1118_vm5, %v1070_v49 }
 0x126   : > { %890 = vrot.lane.b32.xlu1 %v837_v44, %s2790_s4  ;;  %v863_v0 = vpop.permute.xlu0 %862 }
 0x12a   : > { %v861_v49 = vpop.permute.xlu1 %860 }
 0x12b   : > { %v1025_v54 = vsel %vm275_vm0, %v3225_v18, %v861_v49  ;;  %v1419_v18 = vsel %vm1376_vm6, %v1416_v7, %v1418_v35  ;;  %v1420_v7 = vrot.slane %v3480_v55, 4 }
 0x12d   : > { %v1421_v15 = vsel %vm1376_vm6, %v1418_v35, %v1420_v7 }
 0x12f   : > { %v1180_v38 = vpop.f32.mrf.mxu0 }
 0x130   : > { %2510 = vmatmul.msk.bf16.gmra.mxu1 %vm1118_vm5, %v1389_v10  ;;  %1300 = vst.msk [vmem:[#allocation3] sm:$0xff] %vm275_vm0, %v1180_v38 }
 0x134   : > { %2540 = vmatmul.msk.bf16.gmra.mxu2 %vm1118_vm5, %v1074_v1 }
 0x135   : > { %2498 = vmatmul.msk.bf16.gmra.mxu3 %vm1118_vm5, %v3480_v55  ;;  %2482 = vmatmul.msk.bf16.gmra.mxu0 %vm1118_vm5, %v1072_v40  ;;  %v3523_v40 = vsel %vm1056_vm4, %v1025_v54, %v971_v36 }
 0x136   : > { %v1396_v58 = vrot.slane %v3523_v40, 4 }
 0x137   : > { %v1182_v26 = vpop.f32.mrf.mxu0  ;;  %v1635_v56 = vld [vmem:[#allocation3] sm:$0xff] }
 0x138   : > { %1301 = vst.msk [vmem:[#allocation3 + $0x8] sm:$0xff] %vm275_vm0, %v1182_v26  ;;  %v973_v26 = vpop.permute.xlu1 %972  ;;  %v1397_v3 = vsel %vm1376_vm6, %v1394_v20, %v1396_v58 }
 0x13f   : > { %v1636_v41 = vld [vmem:[#allocation3 + $0x8] sm:$0xff] }
 0x140   : > { %2511 = vmatmul.msk.bf16.gmra.mxu1 %vm1118_vm5, %v1391_v12 }
 0x144   : > { %2541 = vmatmul.msk.bf16.gmra.mxu2 %vm1118_vm5, %v1076_v2 }
 0x145   : > { %2523 = vmatmul.msk.bf16.vlgmr.msrb.gmra.mxu3 %vm1118_vm5, %v1415_v33  ;;  %2483 = vmatmul.msk.bf16.gmra.mxu0 %vm1118_vm5, %v1074_v1 }
 0x150   : > { %2512 = vmatmul.msk.bf16.gmra.mxu1 %vm1118_vm5, %v1393_v6  ;;  %v1027_v6 = vsel %vm275_vm0, %v3227_v46, %v863_v0 }
 0x152   : > { %v1185_v13 = vpop.f32.mrf.mxu0 }
 0x153   : > { %1302 = vst.msk [vmem:[#allocation3 + $0x10] sm:$0xff] %vm275_vm0, %v1185_v13  ;;  %v865_v13 = vpop.permute.xlu2 %864 }
 0x154   : > { %2542 = vmatmul.msk.bf16.gmra.mxu2 %vm1118_vm5, %v1078_v57 }
 0x155   : > { %2524 = vmatmul.msk.bf16.gmra.mxu3 %vm1118_vm5, %v1417_v59  ;;  %2484 = vmatmul.msk.bf16.gmra.mxu0 %vm1118_vm5, %v1076_v2  ;;  %v3557_v59 = vsel %vm1056_vm4, %v1027_v6, %v973_v26 }
 0x15a   : > { %v1187_v43 = vpop.f32.mrf.mxu0  ;;  %v1637_v12 = vld [vmem:[#allocation3 + $0x10] sm:$0xff] }
 0x15b   : > { %1303 = vst.msk [vmem:[#allocation3 + $0x18] sm:$0xff] %vm275_vm0, %v1187_v43 }
 0x15d   : > { %v1515_v29 = vpop.f32.mrf.mxu1 }
 0x15e   : > { %v1683_v50 = vadd.f32 %v1635_v56, %v1515_v29  ;;  %v887_v56 = vpop.permute.xlu1 %886 }
 0x15f   : > { %v1051_v35 = vsel %vm275_vm0, %v3215_v28, %v887_v56 }
 0x160   : > { %1731 = vst.msk [vmem:[#allocation3] sm:$0xff] %vm275_vm0, %v1683_v50  ;;  %2513 = vmatmul.msk.bf16.gmra.mxu1 %vm1118_vm5, %v1395_v34  ;;  %v975_v50 = vpop.permute.xlu0 %974 }
 0x162   : > { %v1190_v62 = vpop.f32.mrf.mxu0  ;;  %v1638_v43 = vld [vmem:[#allocation3 + $0x18] sm:$0xff] }
 0x163   : > { %1304 = vst.msk [vmem:[#allocation3 + $0x20] sm:$0xff] %vm275_vm0, %v1190_v62 }
 0x164   : > { %2543 = vmatmul.msk.bf16.gmra.mxu2 %vm1118_vm5, %v3523_v40  ;;  %v1270_v10 = vpop.f32.mrf.mxu3 }
 0x165   : > { %v1517_v27 = vpop.f32.mrf.mxu1  ;;  %2525 = vmatmul.msk.bf16.gmra.mxu3 %vm1118_vm5, %v1419_v18  ;;  %1336 = vst.msk [vmem:[#allocation3 + $0x120] sm:$0xff] %vm275_vm0, %v1270_v10  ;;  %2485 = vmatmul.msk.bf16.gmra.mxu0 %vm1118_vm5, %v1078_v57  ;;  %v1398_v18 = vrot.slane %v3557_v59, 4 }
 0x166   : > { %v1684_v25 = vadd.f32 %v1636_v41, %v1517_v27  ;;  %v997_v27 = vpop.permute.xlu2 %996 }
 0x167   : > { %v1805_v53 = vpop.f32.mrf.mxu2  ;;  %v1925_v16 = vld [vmem:[#allocation3] sm:$0xff] }
 0x168   : > { %1732 = vst.msk [vmem:[#allocation3 + $0x8] sm:$0xff] %vm275_vm0, %v1684_v25  ;;  %v1973_v1 = vadd.f32 %v1925_v16, %v1805_v53  ;;  %v946_v25 = vrot.slane %v3513_v5, 1  ;;  %v3585_v53 = vsel %vm1056_vm4, %v1051_v35, %v997_v27  ;;  %v1029_v5 = vsel %vm275_vm0, %v3235_v52, %v865_v13 }
 0x169   : > { %v1422_v0 = vrot.slane %v3585_v53, 4 }
 0x16a   : > { %2021 = vst.msk [vmem:[#allocation3] sm:$0xff] %vm275_vm0, %v1973_v1  ;;  %v1192_v38 = vpop.f32.mrf.mxu0  ;;  %v1639_v10 = vld [vmem:[#allocation3 + $0x20] sm:$0xff] }
 0x16b   : > { %1305 = vst.msk [vmem:[#allocation3 + $0x28] sm:$0xff] %vm275_vm0, %v1192_v38  ;;  %v1423_v52 = vsel %vm1376_vm6, %v1420_v7, %v1422_v0 }
 0x16c   : > { %v1272_v14 = vpop.f32.mrf.mxu3 }
 0x16d   : > { %v1520_v32 = vpop.f32.mrf.mxu1  ;;  %1337 = vst.msk [vmem:[#allocation3 + $0x128] sm:$0xff] %vm275_vm0, %v1272_v14 }
 0x16e   : > { %v1685_v2 = vadd.f32 %v1637_v12, %v1520_v32  ;;  %v947_v12 = vsel %vm892_vm2, %v944_v30, %v946_v25  ;;  %v1399_v32 = vsel %vm1376_vm6, %v1396_v58, %v1398_v18  ;;  %v3604_v58 = vsel %vm1056_vm4, %v1029_v5, %v975_v50 }
 0x16f   : > { %v1807_v33 = vpop.f32.mrf.mxu2  ;;  %v1926_v51 = vld [vmem:[#allocation3 + $0x8] sm:$0xff]  ;;  %1000 = vrot.lane.b32.xlu2 %v947_v12, %s2791_s5  ;;  %s3939_s5 = scalar_lea.vmem [#allocation4], %s2466_s27 }
 0x170   : > { %1733 = vst.msk [vmem:[#allocation3 + $0x10] sm:$0xff] %vm275_vm0, %v1685_v2  ;;  %v1974_v8 = vadd.f32 %v1926_v51, %v1807_v33  ;;  %2514 = vmatmul.msk.bf16.gmra.mxu1 %vm1118_vm5, %v1397_v3  ;;  %v867_v33 = vpop.permute.xlu0 %866  ;;  %s2365_s11 = sshll.u32 %s3939_s5, 4  ;;  %s2366_s11 = int_to_ptr.vmem [resolvable:$true] %s2365_s11 }
 0x171   : > { %v2069_v19 = vld [vmem:[#allocation3] sm:$0xff] }
 0x172   : > { %v2101_v57 = vpack.c.bf16 %v2069_v19, %v2069_v19  ;;  %2022 = vst.msk [vmem:[#allocation3 + $0x8] sm:$0xff] %vm275_vm0, %v1974_v8  ;;  %v1195_v46 = vpop.f32.mrf.mxu0  ;;  %v2235_v49 = vmul.f32 %v2069_v19, %v2069_v19  ;;  %v2166_v39 = vsel %vm275_vm0, %v2069_v19, 0.0  ;;  %v1640_v51 = vld [vmem:[#allocation3 + $0x28] sm:$0xff] }
 0x173   : > { %1306 = vst.msk [vmem:[#allocation3 + $0x30] sm:$0xff] %vm275_vm0, %v1195_v46  ;;  %v889_v46 = vpop.permute.xlu2 %888 }
 0x174   : > { %2134 = vst.msk [vmem:[%s3553_s6] sm:$0xf] %vm2133_vm7, %v2101_v57  ;;  %2544 = vmatmul.msk.bf16.gmra.mxu2 %vm1118_vm5, %v3557_v59  ;;  %v2267_v28 = vsel %vm275_vm0, %v2235_v49, 0.0  ;;  %v1053_v7 = vsel %vm275_vm0, %v3287_v17, %v889_v46 }
 0x175   : > { %v1522_v20 = vpop.f32.mrf.mxu1  ;;  %2526 = vmatmul.msk.bf16.gmra.mxu3 %vm1118_vm5, %v1421_v15  ;;  %2486 = vmatmul.msk.bf16.gmra.mxu0 %vm1118_vm5, %v3523_v40 }
 0x176   : > { %v1686_v9 = vadd.f32 %v1638_v43, %v1522_v20 }
 0x177   : > { %v1810_v29 = vpop.f32.mrf.mxu2  ;;  %v1927_v11 = vld [vmem:[#allocation3 + $0x10] sm:$0xff] }
 0x178   : > { %1734 = vst.msk [vmem:[#allocation3 + $0x18] sm:$0xff] %vm275_vm0, %v1686_v9  ;;  %v1975_v34 = vadd.f32 %v1927_v11, %v1810_v29  ;;  %v1275_v54 = vpop.f32.mrf.mxu3  ;;  %v1400_v11 = vrot.slane %v3604_v58, 4  ;;  %v999_v49 = vpop.permute.xlu0 %998 }
 0x179   : > { %v2070_v21 = vld [vmem:[#allocation3 + $0x8] sm:$0xff]  ;;  %1338 = vst.msk [vmem:[#allocation3 + $0x130] sm:$0xff] %vm275_vm0, %v1275_v54  ;;  %v3629_v17 = vsel %vm1056_vm4, %v1053_v7, %v999_v49 }
 0x17a   : > { %v2102_v36 = vpack.c.bf16 %v2070_v21, %v2070_v21  ;;  %v2167_v62 = vsel %vm275_vm0, %v2070_v21, 0.0  ;;  %v2236_v41 = vmul.f32 %v2070_v21, %v2070_v21  ;;  %2023 = vst.msk [vmem:[#allocation3 + $0x10] sm:$0xff] %vm275_vm0, %v1975_v34  ;;  %v1197_v48 = vpop.f32.mrf.mxu0  ;;  %v1641_v50 = vld [vmem:[#allocation3 + $0x30] sm:$0xff] }
 0x17b   : > { %v2168_v42 = vadd.f32 %v2167_v62, %v2166_v39  ;;  %1307 = vst.msk [vmem:[#allocation3 + $0x38] sm:$0xff] %vm275_vm0, %v1197_v48  ;;  %v1401_v62 = vsel %vm1376_vm6, %v1398_v18, %v1400_v11  ;;  %v1424_v48 = vrot.slane %v3629_v17, 4  ;;  %v979_v7 = vpop.permute.xlu2 %978 }
 0x17c   : > { %2135 = vst.msk [vmem:[%s3553_s6 + $0x4] sm:$0xf] %vm2133_vm7, %v2102_v36  ;;  %v2268_v44 = vsel %vm275_vm0, %v2236_v41, 0.0  ;;  %v1031_v41 = vsel %vm275_vm0, %v3260_v37, %v867_v33 }
 0x17d   : > { %v2269_v16 = vadd.f32 %v2268_v44, %v2267_v28  ;;  %v1525_v1 = vpop.f32.mrf.mxu1  ;;  %v1425_v12 = vsel %vm1376_vm6, %v1422_v0, %v1424_v48 }
 0x17e   : > { %v1687_v38 = vadd.f32 %v1639_v10, %v1525_v1 }
 0x17f   : > { %v1812_v26 = vpop.f32.mrf.mxu2  ;;  %v1928_v14 = vld [vmem:[#allocation3 + $0x18] sm:$0xff] }
 0x180   : > { %1735 = vst.msk [vmem:[#allocation3 + $0x20] sm:$0xff] %vm275_vm0, %v1687_v38  ;;  %v1976_v2 = vadd.f32 %v1928_v14, %v1812_v26  ;;  %2515 = vmatmul.msk.bf16.gmra.mxu1 %vm1118_vm5, %v1399_v32  ;;  %v1277_v30 = vpop.f32.mrf.mxu3 }
 0x181   : > { %1339 = vst.msk [vmem:[#allocation3 + $0x138] sm:$0xff] %vm275_vm0, %v1277_v30 }
 0x182   : > { %2024 = vst.msk [vmem:[#allocation3 + $0x18] sm:$0xff] %vm275_vm0, %v1976_v2  ;;  %v1200_v40 = vpop.f32.mrf.mxu0  ;;  %v1642_v1 = vld [vmem:[#allocation3 + $0x38] sm:$0xff] }
 0x183   : > { %1308 = vst.msk [vmem:[#allocation3 + $0x40] sm:$0xff] %vm275_vm0, %v1200_v40 }
 0x184   : > { %2545 = vmatmul.msk.bf16.gmra.mxu2 %vm1118_vm5, %v3604_v58 }
 0x185   : > { %v1527_v3 = vpop.f32.mrf.mxu1  ;;  %2527 = vmatmul.msk.bf16.gmra.mxu3 %vm1118_vm5, %v1423_v52  ;;  %2487 = vmatmul.msk.bf16.gmra.mxu0 %vm1118_vm5, %v3557_v59 }
 0x186   : > { %v1688_v6 = vadd.f32 %v1640_v51, %v1527_v3 }
 0x187   : > { %v1815_v8 = vpop.f32.mrf.mxu2  ;;  %v1929_v19 = vld [vmem:[#allocation3 + $0x20] sm:$0xff] }
 0x188   : > { %1736 = vst.msk [vmem:[#allocation3 + $0x28] sm:$0xff] %vm275_vm0, %v1688_v6  ;;  %v1977_v13 = vadd.f32 %v1929_v19, %v1815_v8  ;;  %v1280_v57 = vpop.f32.mrf.mxu3 }
 0x189   : > { %v2071_v43 = vld [vmem:[#allocation3 + $0x18] sm:$0xff]  ;;  %1340 = vst.msk [vmem:[#allocation3 + $0x140] sm:$0xff] %vm275_vm0, %v1280_v57 }
 0x18a   : > { %v2103_v15 = vpack.c.bf16 %v2071_v43, %v2071_v43  ;;  %v2169_v20 = vsel %vm275_vm0, %v2071_v43, 0.0  ;;  %v2237_v56 = vmul.f32 %v2071_v43, %v2071_v43  ;;  %2025 = vst.msk [vmem:[#allocation3 + $0x20] sm:$0xff] %vm275_vm0, %v1977_v13  ;;  %v1202_v9 = vpop.f32.mrf.mxu0  ;;  %v1643_v51 = vld [vmem:[#allocation3 + $0x40] sm:$0xff] }
 0x18b   : > { %v2170_v29 = vadd.f32 %v2169_v20, %v2168_v42  ;;  %1309 = vst.msk [vmem:[#allocation3 + $0x48] sm:$0xff] %vm275_vm0, %v1202_v9  ;;  %v977_v42 = vpop.permute.xlu1 %976 }
 0x18c   : > { %2136 = vst.msk [vmem:[%s3553_s6 + $0x8] sm:$0xf] %vm2133_vm7, %v2103_v15  ;;  %v2270_v34 = vsel %vm275_vm0, %v2237_v56, 0.0 }
 0x18d   : > { %v2271_v54 = vadd.f32 %v2270_v34, %v2269_v16  ;;  %v1530_v35 = vpop.f32.mrf.mxu1  ;;  %v3643_v16 = vsel %vm1056_vm4, %v1031_v41, %v977_v42 }
 0x18e   : > { %v1689_v21 = vadd.f32 %v1641_v50, %v1530_v35  ;;  %v1402_v0 = vrot.slane %v3643_v16, 4 }
 0x18f   : > { %v1817_v39 = vpop.f32.mrf.mxu2  ;;  %v1930_v36 = vld [vmem:[#allocation3 + $0x28] sm:$0xff] }
 0x190   : > { %1737 = vst.msk [vmem:[#allocation3 + $0x30] sm:$0xff] %vm275_vm0, %v1689_v21  ;;  %v1978_v10 = vadd.f32 %v1930_v36, %v1817_v39  ;;  %2516 = vmatmul.msk.bf16.gmra.mxu1 %vm1118_vm5, %v1401_v62  ;;  %v1282_v27 = vpop.f32.mrf.mxu3  ;;  %v1403_v19 = vsel %vm1376_vm6, %v1400_v11, %v1402_v0 }
 0x191   : > { %v2072_v28 = vld [vmem:[#allocation3 + $0x20] sm:$0xff]  ;;  %1341 = vst.msk [vmem:[#allocation3 + $0x148] sm:$0xff] %vm275_vm0, %v1282_v27 }
 0x192   : > { %v2104_v44 = vpack.c.bf16 %v2072_v28, %v2072_v28  ;;  %v2171_v59 = vsel %vm275_vm0, %v2072_v28, 0.0  ;;  %v2238_v18 = vmul.f32 %v2072_v28, %v2072_v28  ;;  %2026 = vst.msk [vmem:[#allocation3 + $0x28] sm:$0xff] %vm275_vm0, %v1978_v10  ;;  %v1205_v37 = vpop.f32.mrf.mxu0  ;;  %v1644_v11 = vld [vmem:[#allocation3 + $0x48] sm:$0xff] }
 0x193   : > { %v2172_v25 = vadd.f32 %v2171_v59, %v2170_v29  ;;  %1310 = vst.msk [vmem:[#allocation3 + $0x50] sm:$0xff] %vm275_vm0, %v1205_v37  ;;  %v869_v52 = vpop.permute.xlu1 %868 }
 0x194   : > { %2137 = vst.msk [vmem:[%s3553_s6 + $0xc] sm:$0xf] %vm2133_vm7, %v2104_v44  ;;  %v2272_v38 = vsel %vm275_vm0, %v2238_v18, 0.0  ;;  %2546 = vmatmul.msk.bf16.gmra.mxu2 %vm1118_vm5, %v3643_v16  ;;  %v1033_v13 = vsel %vm275_vm0, %v3276_v63, %v869_v52 }
 0x195   : > { %v2273_v26 = vadd.f32 %v2272_v38, %v2271_v54  ;;  %v1532_v14 = vpop.f32.mrf.mxu1  ;;  %2528 = vmatmul.msk.bf16.gmra.mxu3 %vm1118_vm5, %v1425_v12  ;;  %2488 = vmatmul.msk.bf16.gmra.mxu0 %vm1118_vm5, %v3604_v58  ;;  %v3671_v63 = vsel %vm1056_vm4, %v1033_v13, %v979_v7 }
 0x196   : > { %v1690_v32 = vadd.f32 %v1642_v1, %v1532_v14  ;;  %v1404_v27 = vrot.slane %v3671_v63, 4 }
 0x197   : > { %v1820_v5 = vpop.f32.mrf.mxu2  ;;  %v1931_v2 = vld [vmem:[#allocation3 + $0x30] sm:$0xff] }
 0x198   : > { %1738 = vst.msk [vmem:[#allocation3 + $0x38] sm:$0xff] %vm275_vm0, %v1690_v32  ;;  %v1979_v30 = vadd.f32 %v1931_v2, %v1820_v5  ;;  %v1285_v33 = vpop.f32.mrf.mxu3  ;;  %v1405_v38 = vsel %vm1376_vm6, %v1402_v0, %v1404_v27 }
 0x199   : > { %1342 = vst.msk [vmem:[#allocation3 + $0x150] sm:$0xff] %vm275_vm0, %v1285_v33 }
 0x19a   : > { %2027 = vst.msk [vmem:[#allocation3 + $0x30] sm:$0xff] %vm275_vm0, %v1979_v30  ;;  %v1207_v40 = vpop.f32.mrf.mxu0  ;;  %v1645_v28 = vld [vmem:[#allocation3 + $0x50] sm:$0xff] }
 0x19b   : > { %1311 = vst.msk [vmem:[#allocation3 + $0x58] sm:$0xff] %vm275_vm0, %v1207_v40 }
 0x19d   : > { %v1535_v3 = vpop.f32.mrf.mxu1 }
 0x19e   : > { %v1691_v58 = vadd.f32 %v1643_v51, %v1535_v3 }
 0x19f   : > { %v1822_v6 = vpop.f32.mrf.mxu2  ;;  %v1932_v8 = vld [vmem:[#allocation3 + $0x38] sm:$0xff] }
 0x1a0   : > { %1739 = vst.msk [vmem:[#allocation3 + $0x40] sm:$0xff] %vm275_vm0, %v1691_v58  ;;  %v1980_v57 = vadd.f32 %v1932_v8, %v1822_v6  ;;  %2517 = vmatmul.msk.bf16.gmra.mxu1 %vm1118_vm5, %v1403_v19  ;;  %v1287_v46 = vpop.f32.mrf.mxu3 }
 0x1a1   : > { %v2073_v43 = vld [vmem:[#allocation3 + $0x30] sm:$0xff]  ;;  %1343 = vst.msk [vmem:[#allocation3 + $0x158] sm:$0xff] %vm275_vm0, %v1287_v46 }
 0x1a2   : > { %v2105_v15 = vpack.c.bf16 %v2073_v43, %v2073_v43  ;;  %v2173_v20 = vsel %vm275_vm0, %v2073_v43, 0.0  ;;  %v2239_v56 = vmul.f32 %v2073_v43, %v2073_v43  ;;  %2028 = vst.msk [vmem:[#allocation3 + $0x38] sm:$0xff] %vm275_vm0, %v1980_v57  ;;  %v1210_v9 = vpop.f32.mrf.mxu0  ;;  %v1646_v30 = vld [vmem:[#allocation3 + $0x58] sm:$0xff]  ;;  %v873_v43 = vpop.permute.xlu2 %872 }
 0x1a3   : > { %v2174_v29 = vadd.f32 %v2173_v20, %v2172_v25  ;;  %1312 = vst.msk [vmem:[#allocation3 + $0x60] sm:$0xff] %vm275_vm0, %v1210_v9  ;;  %v871_v25 = vpop.permute.xlu0 %870 }
 0x1a4   : > { %2138 = vst.msk [vmem:[%s3553_s6 + $0x10] sm:$0xf] %vm2133_vm7, %v2105_v15  ;;  %v2274_v50 = vsel %vm275_vm0, %v2239_v56, 0.0  ;;  %2547 = vmatmul.msk.bf16.gmra.mxu2 %vm1118_vm5, %v3671_v63  ;;  %v1035_v12 = vsel %vm275_vm0, %v3327_v22, %v871_v25 }
 0x1a5   : > { %v2275_v49 = vadd.f32 %v2274_v50, %v2273_v26  ;;  %v1537_v34 = vpop.f32.mrf.mxu1  ;;  %2553 = vmatmul.msk.bf16.vlgmr.msra.gmra.mxu3 %vm1118_vm5, %v3452_v60  ;;  %2489 = vmatmul.msk.bf16.gmra.mxu0 %vm1118_vm5, %v3643_v16  ;;  %v981_v26 = vpop.permute.xlu1 %980 }
 0x1a6   : > { %v1692_v54 = vadd.f32 %v1644_v11, %v1537_v34  ;;  %v3700_v2 = vsel %vm1056_vm4, %v1035_v12, %v981_v26 }
 0x1a7   : > { %v1825_v35 = vpop.f32.mrf.mxu2  ;;  %v1933_v21 = vld [vmem:[#allocation3 + $0x40] sm:$0xff]  ;;  %v1406_v19 = vrot.slane %v3700_v2, 4 }
 0x1a8   : > { %1740 = vst.msk [vmem:[#allocation3 + $0x48] sm:$0xff] %vm275_vm0, %v1692_v54  ;;  %v1981_v39 = vadd.f32 %v1933_v21, %v1825_v35  ;;  %v1290_v36 = vpop.f32.mrf.mxu3 }
 0x1a9   : > { %v2074_v62 = vld [vmem:[#allocation3 + $0x38] sm:$0xff]  ;;  %1344 = vst.msk [vmem:[#allocation3 + $0x160] sm:$0xff] %vm275_vm0, %v1290_v36 }
 0x1aa   : > { %v2106_v41 = vpack.c.bf16 %v2074_v62, %v2074_v62  ;;  %v2175_v48 = vsel %vm275_vm0, %v2074_v62, 0.0  ;;  %v2240_v42 = vmul.f32 %v2074_v62, %v2074_v62  ;;  %2029 = vst.msk [vmem:[#allocation3 + $0x40] sm:$0xff] %vm275_vm0, %v1981_v39  ;;  %v1212_v60 = vpop.f32.mrf.mxu0  ;;  %v1647_v57 = vld [vmem:[#allocation3 + $0x60] sm:$0xff] }
 0x1ab   : > { %v2176_v10 = vadd.f32 %v2175_v48, %v2174_v29  ;;  %1313 = vst.msk [vmem:[#allocation3 + $0x68] sm:$0xff] %vm275_vm0, %v1212_v60  ;;  %v1407_v29 = vsel %vm1376_vm6, %v1404_v27, %v1406_v19  ;;  %v983_v11 = vpop.permute.xlu0 %982 }
 0x1ac   : > { %2139 = vst.msk [vmem:[%s3553_s6 + $0x14] sm:$0xf] %vm2133_vm7, %v2106_v41  ;;  %v2276_v44 = vsel %vm275_vm0, %v2240_v42, 0.0 }
 0x1ad   : > { %v2277_v59 = vadd.f32 %v2276_v44, %v2275_v49  ;;  %v1540_v18 = vpop.f32.mrf.mxu1 }
 0x1ae   : > { %v1693_v37 = vadd.f32 %v1645_v28, %v1540_v18 }
 0x1af   : > { %v1827_v16 = vpop.f32.mrf.mxu2  ;;  %v1934_v1 = vld [vmem:[#allocation3 + $0x48] sm:$0xff] }
 0x1b0   : > { %1741 = vst.msk [vmem:[#allocation3 + $0x50] sm:$0xff] %vm275_vm0, %v1693_v37  ;;  %v1982_v14 = vadd.f32 %v1934_v1, %v1827_v16  ;;  %2518 = vmatmul.msk.bf16.gmra.mxu1 %vm1118_vm5, %v1405_v38  ;;  %v1292_v32 = vpop.f32.mrf.mxu3 }
 0x1b1   : > { %1345 = vst.msk [vmem:[#allocation3 + $0x168] sm:$0xff] %vm275_vm0, %v1292_v32 }
 0x1b2   : > { %2030 = vst.msk [vmem:[#allocation3 + $0x48] sm:$0xff] %vm275_vm0, %v1982_v14  ;;  %v1215_v5 = vpop.f32.mrf.mxu0  ;;  %v1648_v62 = vld [vmem:[#allocation3 + $0x68] sm:$0xff] }
 0x1b3   : > { %1314 = vst.msk [vmem:[#allocation3 + $0x70] sm:$0xff] %vm275_vm0, %v1215_v5  ;;  %v1672_v5 = vld [vmem:[#allocation3 + $0x128] sm:$0xff] }
 0x1b4   : > { %2548 = vmatmul.msk.bf16.gmra.mxu2 %vm1118_vm5, %v3700_v2 }
 0x1b5   : > { %v1542_v22 = vpop.f32.mrf.mxu1  ;;  %2554 = vmatmul.msk.bf16.gmra.mxu3 %vm1118_vm5, %v3466_v24  ;;  %2490 = vmatmul.msk.bf16.gmra.mxu0 %vm1118_vm5, %v3671_v63  ;;  %v1037_v63 = vsel %vm275_vm0, %v3335_v31, %v873_v43 }
 0x1b6   : > { %v1694_v33 = vadd.f32 %v1646_v30, %v1542_v22  ;;  %v3727_v31 = vsel %vm1056_vm4, %v1037_v63, %v983_v11  ;;  %v1410_v11 = vrot.slane %v3391_v45, 4 }
 0x1b7   : > { %v1830_v40 = vpop.f32.mrf.mxu2  ;;  %v1935_v0 = vld [vmem:[#allocation3 + $0x50] sm:$0xff] }
 0x1b8   : > { %1742 = vst.msk [vmem:[#allocation3 + $0x58] sm:$0xff] %vm275_vm0, %v1694_v33  ;;  %v1983_v51 = vadd.f32 %v1935_v0, %v1830_v40  ;;  %v1295_v52 = vpop.f32.mrf.mxu3 }
 0x1b9   : > { %v2075_v3 = vld [vmem:[#allocation3 + $0x48] sm:$0xff]  ;;  %1346 = vst.msk [vmem:[#allocation3 + $0x170] sm:$0xff] %vm275_vm0, %v1295_v52 }
 0x1ba   : > { %v2107_v58 = vpack.c.bf16 %v2075_v3, %v2075_v3  ;;  %v2177_v6 = vsel %vm275_vm0, %v2075_v3, 0.0  ;;  %v2241_v8 = vmul.f32 %v2075_v3, %v2075_v3  ;;  %2031 = vst.msk [vmem:[#allocation3 + $0x50] sm:$0xff] %vm275_vm0, %v1983_v51  ;;  %v1217_v24 = vpop.f32.mrf.mxu0  ;;  %v1649_v25 = vld [vmem:[#allocation3 + $0x70] sm:$0xff] }
 0x1bb   : > { %v2178_v13 = vadd.f32 %v2177_v6, %v2176_v10  ;;  %1315 = vst.msk [vmem:[#allocation3 + $0x78] sm:$0xff] %vm275_vm0, %v1217_v24 }
 0x1bc   : > { %2140 = vst.msk [vmem:[%s3553_s6 + $0x18] sm:$0xf] %vm2133_vm7, %v2107_v58  ;;  %v2278_v46 = vsel %vm275_vm0, %v2241_v8, 0.0 }
 0x1bd   : > { %v2279_v7 = vadd.f32 %v2278_v46, %v2277_v59  ;;  %v1545_v15 = vpop.f32.mrf.mxu1  ;;  %v1671_v59 = vld [vmem:[#allocation3 + $0x120] sm:$0xff]  ;;  %v1673_v46 = vld [vmem:[#allocation3 + $0x130] sm:$0xff] }
 0x1be   : > { %v1695_v20 = vadd.f32 %v1647_v57, %v1545_v15 }
 0x1bf   : > { %v1832_v56 = vpop.f32.mrf.mxu2  ;;  %v1936_v9 = vld [vmem:[#allocation3 + $0x58] sm:$0xff] }
 0x1c0   : > { %1743 = vst.msk [vmem:[#allocation3 + $0x60] sm:$0xff] %vm275_vm0, %v1695_v20  ;;  %v1984_v50 = vadd.f32 %v1936_v9, %v1832_v56  ;;  %2519 = vmatmul.msk.bf16.gmra.mxu1 %vm1118_vm5, %v1407_v29  ;;  %v1297_v49 = vpop.f32.mrf.mxu3 }
 0x1c1   : > { %v2076_v34 = vld [vmem:[#allocation3 + $0x50] sm:$0xff]  ;;  %1347 = vst.msk [vmem:[#allocation3 + $0x178] sm:$0xff] %vm275_vm0, %v1297_v49 }
 0x1c2   : > { %v2108_v54 = vpack.c.bf16 %v2076_v34, %v2076_v34  ;;  %v2179_v35 = vsel %vm275_vm0, %v2076_v34, 0.0  ;;  %v2242_v21 = vmul.f32 %v2076_v34, %v2076_v34  ;;  %2032 = vst.msk [vmem:[#allocation3 + $0x58] sm:$0xff] %vm275_vm0, %v1984_v50  ;;  %v1220_v39 = vpop.f32.mrf.mxu0  ;;  %v1650_v52 = vld [vmem:[#allocation3 + $0x78] sm:$0xff] }
 0x1c3   : > { %v2180_v36 = vadd.f32 %v2179_v35, %v2178_v13  ;;  %1316 = vst.msk [vmem:[#allocation3 + $0x80] sm:$0xff] %vm275_vm0, %v1220_v39 }
 0x1c4   : > { %2141 = vst.msk [vmem:[%s3553_s6 + $0x1c] sm:$0xf] %vm2133_vm7, %v2108_v54  ;;  %v2280_v41 = vsel %vm275_vm0, %v2242_v21, 0.0  ;;  %2549 = vmatmul.msk.bf16.gmra.mxu2 %vm1118_vm5, %v3727_v31 }
 0x1c5   : > { %v2281_v48 = vadd.f32 %v2280_v41, %v2279_v7  ;;  %v1547_v42 = vpop.f32.mrf.mxu1  ;;  %2555 = vmatmul.msk.bf16.gmra.mxu3 %vm1118_vm5, %v3480_v55  ;;  %2491 = vmatmul.msk.bf16.gmra.mxu0 %vm1118_vm5, %v3700_v2  ;;  %v1408_v55 = vrot.slane %v3727_v31, 4 }
 0x1c6   : > { %v1696_v60 = vadd.f32 %v1648_v62, %v1547_v42 }
 0x1c7   : > { %v1835_v10 = vpop.f32.mrf.mxu2  ;;  %v1937_v27 = vld [vmem:[#allocation3 + $0x60] sm:$0xff]  ;;  %v1409_v26 = vsel %vm1376_vm6, %v1406_v19, %v1408_v55  ;;  %v1411_v21 = vsel %vm1376_vm6, %v1408_v55, %v1410_v11 }
 0x1c8   : > { %1744 = vst.msk [vmem:[#allocation3 + $0x68] sm:$0xff] %vm275_vm0, %v1696_v60  ;;  %v1985_v28 = vadd.f32 %v1937_v27, %v1835_v10  ;;  %v1605_v44 = vpop.f32.mrf.mxu3 }
 0x1c9   : > { %v1719_v18 = vadd.f32 %v1671_v59, %v1605_v44  ;;  %v1675_v44 = vld [vmem:[#allocation3 + $0x140] sm:$0xff] }
 0x1ca   : > { %2033 = vst.msk [vmem:[#allocation3 + $0x60] sm:$0xff] %vm275_vm0, %v1985_v28  ;;  %v1222_v37 = vpop.f32.mrf.mxu0  ;;  %v1651_v29 = vld [vmem:[#allocation3 + $0x80] sm:$0xff] }
 0x1cb   : > { %1767 = vst.msk [vmem:[#allocation3 + $0x120] sm:$0xff] %vm275_vm0, %v1719_v18 }
 0x1cc   : > { %1317 = vst.msk [vmem:[#allocation3 + $0x88] sm:$0xff] %vm275_vm0, %v1222_v37 }
 0x1cd   : > { %v1550_v16 = vpop.f32.mrf.mxu1 }
 0x1ce   : > { %v1697_v1 = vadd.f32 %v1649_v25, %v1550_v16 }
 0x1cf   : > { %v1837_v38 = vpop.f32.mrf.mxu2  ;;  %v1938_v12 = vld [vmem:[#allocation3 + $0x68] sm:$0xff] }
 0x1d0   : > { %1745 = vst.msk [vmem:[#allocation3 + $0x70] sm:$0xff] %vm275_vm0, %v1697_v1  ;;  %v1986_v14 = vadd.f32 %v1938_v12, %v1837_v38  ;;  %2520 = vmatmul.msk.bf16.gmra.mxu1 %vm1118_vm5, %v1409_v26  ;;  %v1607_v32 = vpop.f32.mrf.mxu3  ;;  %v891_v12 = vpop.permute.xlu1 %890 }
 0x1d1   : > { %v2077_v2 = vld [vmem:[#allocation3 + $0x60] sm:$0xff]  ;;  %v1720_v30 = vadd.f32 %v1672_v5, %v1607_v32 }
 0x1d2   : > { %v2109_v22 = vpack.c.bf16 %v2077_v2, %v2077_v2  ;;  %v2181_v33 = vsel %vm275_vm0, %v2077_v2, 0.0  ;;  %v2243_v40 = vmul.f32 %v2077_v2, %v2077_v2  ;;  %2034 = vst.msk [vmem:[#allocation3 + $0x68] sm:$0xff] %vm275_vm0, %v1986_v14  ;;  %v1225_v0 = vpop.f32.mrf.mxu0 }
 0x1d3   : > { %v2182_v51 = vadd.f32 %v2181_v33, %v2180_v36  ;;  %1768 = vst.msk [vmem:[#allocation3 + $0x128] sm:$0xff] %vm275_vm0, %v1720_v30  ;;  %v1674_v36 = vld [vmem:[#allocation3 + $0x138] sm:$0xff]  ;;  %v1652_v41 = vld [vmem:[#allocation3 + $0x88] sm:$0xff]  ;;  %v1413_v30 = vsel %vm1376_vm6, %v1410_v11, %v1412_v23  ;;  %v1001_v33 = vpop.permute.xlu2 %1000 }
 0x1d4   : > { %2142 = vst.msk [vmem:[%s3553_s6 + $0x20] sm:$0xf] %vm2133_vm7, %v2109_v22  ;;  %v2282_v3 = vsel %vm275_vm0, %v2243_v40, 0.0  ;;  %2550 = vmatmul.msk.bf16.gmra.mxu2 %vm1118_vm5, %v3391_v45  ;;  %v1055_v22 = vsel %vm275_vm0, %v3325_v4, %v891_v12 }
 0x1d5   : > { %v2283_v58 = vadd.f32 %v2282_v3, %v2281_v48  ;;  %v1552_v6 = vpop.f32.mrf.mxu1  ;;  %2556 = vmatmul.msk.bf16.gmra.mxu3 %vm1118_vm5, %v3585_v53  ;;  %1318 = vst.msk [vmem:[#allocation3 + $0x90] sm:$0xff] %vm275_vm0, %v1225_v0  ;;  %2492 = vmatmul.msk.bf16.gmra.mxu0 %vm1118_vm5, %v3727_v31  ;;  %v1110_v23 = vsel %vm1056_vm4, %v1055_v22, %v1001_v33 }
 0x1d6   : > { %v1698_v8 = vadd.f32 %v1650_v52, %v1552_v6 }
 0x1d7   : > { %v1840_v24 = vpop.f32.mrf.mxu2  ;;  %v1939_v19 = vld [vmem:[#allocation3 + $0x70] sm:$0xff] }
 0x1d8   : > { %1746 = vst.msk [vmem:[#allocation3 + $0x78] sm:$0xff] %vm275_vm0, %v1698_v8  ;;  %v1987_v13 = vadd.f32 %v1939_v19, %v1840_v24  ;;  %v1610_v57 = vpop.f32.mrf.mxu3 }
 0x1d9   : > { %v2078_v43 = vld [vmem:[#allocation3 + $0x68] sm:$0xff]  ;;  %v1721_v7 = vadd.f32 %v1673_v46, %v1610_v57 }
 0x1da   : > { %v2110_v15 = vpack.c.bf16 %v2078_v43, %v2078_v43  ;;  %v2183_v20 = vsel %vm275_vm0, %v2078_v43, 0.0  ;;  %v2244_v53 = vmul.f32 %v2078_v43, %v2078_v43  ;;  %2035 = vst.msk [vmem:[#allocation3 + $0x70] sm:$0xff] %vm275_vm0, %v1987_v13  ;;  %v1227_v56 = vpop.f32.mrf.mxu0 }
 0x1db   : > { %v2184_v9 = vadd.f32 %v2183_v20, %v2182_v51  ;;  %1769 = vst.msk [vmem:[#allocation3 + $0x130] sm:$0xff] %vm275_vm0, %v1721_v7  ;;  %v1676_v51 = vld [vmem:[#allocation3 + $0x148] sm:$0xff] }
 0x1dc   : > { %2143 = vst.msk [vmem:[%s3553_s6 + $0x24] sm:$0xf] %vm2133_vm7, %v2110_v15  ;;  %v2284_v63 = vsel %vm275_vm0, %v2244_v53, 0.0  ;;  %v1677_v53 = vld [vmem:[#allocation3 + $0x150] sm:$0xff] }
 0x1dd   : > { %v2285_v50 = vadd.f32 %v2284_v63, %v2283_v58  ;;  %v1555_v49 = vpop.f32.mrf.mxu1  ;;  %1319 = vst.msk [vmem:[#allocation3 + $0x98] sm:$0xff] %vm275_vm0, %v1227_v56 }
 0x1de   : > { %v1699_v34 = vadd.f32 %v1651_v29, %v1555_v49 }
 0x1df   : > { %v1842_v54 = vpop.f32.mrf.mxu2  ;;  %v1940_v35 = vld [vmem:[#allocation3 + $0x78] sm:$0xff] }
 0x1e0   : > { %1747 = vst.msk [vmem:[#allocation3 + $0x80] sm:$0xff] %vm275_vm0, %v1699_v34  ;;  %v1988_v39 = vadd.f32 %v1940_v35, %v1842_v54  ;;  %2521 = vmatmul.msk.bf16.gmra.mxu1 %vm1118_vm5, %v1411_v21  ;;  %v1612_v31 = vpop.f32.mrf.mxu3  ;;  %v1678_v54 = vld [vmem:[#allocation3 + $0x158] sm:$0xff] }
 0x1e1   : > { %v1722_v62 = vadd.f32 %v1674_v36, %v1612_v31 }
 0x1e2   : > { %2036 = vst.msk [vmem:[#allocation3 + $0x78] sm:$0xff] %vm275_vm0, %v1988_v39  ;;  %v1230_v45 = vpop.f32.mrf.mxu0 }
 0x1e3   : > { %1770 = vst.msk [vmem:[#allocation3 + $0x138] sm:$0xff] %vm275_vm0, %v1722_v62 }
 0x1e4   : > { %2551 = vmatmul.msk.bf16.gmra.mxu2 %vm1118_vm5, %v3413_v47  ;;  %1320 = vst.msk [vmem:[#allocation3 + $0xa0] sm:$0xff] %vm275_vm0, %v1230_v45  ;;  %v1654_v24 = vld [vmem:[#allocation3 + $0x98] sm:$0xff] }
 0x1e5   : > { %v1557_v48 = vpop.f32.mrf.mxu1  ;;  %2557 = vmatmul.msk.bf16.gmra.mxu3 %vm1118_vm5, %v3629_v17  ;;  %v1653_v17 = vld [vmem:[#allocation3 + $0x90] sm:$0xff] }
 0x1e6   : > { %v1700_v42 = vadd.f32 %v1652_v41, %v1557_v48 }
 0x1e7   : > { %v1845_v60 = vpop.f32.mrf.mxu2  ;;  %v1941_v10 = vld [vmem:[#allocation3 + $0x80] sm:$0xff] }
 0x1e8   : > { %1748 = vst.msk [vmem:[#allocation3 + $0x88] sm:$0xff] %vm275_vm0, %v1700_v42  ;;  %v1989_v27 = vadd.f32 %v1941_v10, %v1845_v60  ;;  %v1615_v28 = vpop.f32.mrf.mxu3 }
 0x1e9   : > { %v2079_v59 = vld [vmem:[#allocation3 + $0x78] sm:$0xff]  ;;  %v1723_v18 = vadd.f32 %v1675_v44, %v1615_v28 }
 0x1ea   : > { %v2111_v37 = vpack.c.bf16 %v2079_v59, %v2079_v59  ;;  %v2185_v25 = vsel %vm275_vm0, %v2079_v59, 0.0  ;;  %v2245_v55 = vmul.f32 %v2079_v59, %v2079_v59  ;;  %2037 = vst.msk [vmem:[#allocation3 + $0x80] sm:$0xff] %vm275_vm0, %v1989_v27  ;;  %v1232_v16 = vpop.f32.mrf.mxu0 }
 0x1eb   : > { %v2186_v1 = vadd.f32 %v2185_v25, %v2184_v9  ;;  %1771 = vst.msk [vmem:[#allocation3 + $0x140] sm:$0xff] %vm275_vm0, %v1723_v18  ;;  %v1655_v29 = vld [vmem:[#allocation3 + $0xa0] sm:$0xff] }
 0x1ec   : > { %2144 = vst.msk [vmem:[%s3553_s6 + $0x28] sm:$0xf] %vm2133_vm7, %v2111_v37  ;;  %v2286_v38 = vsel %vm275_vm0, %v2245_v55, 0.0  ;;  %v1679_v18 = vld [vmem:[#allocation3 + $0x160] sm:$0xff] }
 0x1ed   : > { %v2287_v26 = vadd.f32 %v2286_v38, %v2285_v50  ;;  %v1560_v14 = vpop.f32.mrf.mxu1  ;;  %1321 = vst.msk [vmem:[#allocation3 + $0xa8] sm:$0xff] %vm275_vm0, %v1232_v16 }
 0x1ee   : > { %v1701_v32 = vadd.f32 %v1653_v17, %v1560_v14 }
 0x1ef   : > { %v1847_v5 = vpop.f32.mrf.mxu2  ;;  %v1942_v2 = vld [vmem:[#allocation3 + $0x88] sm:$0xff] }
 0x1f0   : > { %1749 = vst.msk [vmem:[#allocation3 + $0x90] sm:$0xff] %vm275_vm0, %v1701_v32  ;;  %v1990_v40 = vadd.f32 %v1942_v2, %v1847_v5  ;;  %2522 = vmatmul.msk.bf16.gmra.mxu1 %vm1118_vm5, %v1413_v30  ;;  %v1617_v0 = vpop.f32.mrf.mxu3 }
 0x1f1   : > { %v2080_v52 = vld [vmem:[#allocation3 + $0x80] sm:$0xff]  ;;  %v1724_v3 = vadd.f32 %v1676_v51, %v1617_v0 }
 0x1f2   : > { %v2112_v58 = vpack.c.bf16 %v2080_v52, %v2080_v52  ;;  %v2187_v6 = vsel %vm275_vm0, %v2080_v52, 0.0  ;;  %v2246_v47 = vmul.f32 %v2080_v52, %v2080_v52  ;;  %2038 = vst.msk [vmem:[#allocation3 + $0x88] sm:$0xff] %vm275_vm0, %v1990_v40  ;;  %v1235_v4 = vpop.f32.mrf.mxu0  ;;  %v1680_v40 = vld [vmem:[#allocation3 + $0x168] sm:$0xff] }
 0x1f3   : > { %v2188_v8 = vadd.f32 %v2187_v6, %v2186_v1  ;;  %1772 = vst.msk [vmem:[#allocation3 + $0x148] sm:$0xff] %vm275_vm0, %v1724_v3 }
 0x1f4   : > { %2145 = vst.msk [vmem:[%s3553_s6 + $0x2c] sm:$0xf] %vm2133_vm7, %v2112_v58  ;;  %v2288_v19 = vsel %vm275_vm0, %v2246_v47, 0.0  ;;  %2552 = vmatmul.msk.bf16.gmra.mxu2 %vm1118_vm5, %v3432_v61  ;;  %v1656_v41 = vld [vmem:[#allocation3 + $0xa8] sm:$0xff] }
 0x1f5   : > { %v2289_v13 = vadd.f32 %v2288_v19, %v2287_v26  ;;  %v1562_v57 = vpop.f32.mrf.mxu1  ;;  %2558 = vmatmul.msk.bf16.gmra.mxu3 %vm1118_vm5, %v1110_v23  ;;  %1322 = vst.msk [vmem:[#allocation3 + $0xb0] sm:$0xff] %vm275_vm0, %v1235_v4 }
 0x1f6   : > { %v1702_v46 = vadd.f32 %v1654_v24, %v1562_v57 }
 0x1f7   : > { %v1850_v43 = vpop.f32.mrf.mxu2  ;;  %v1943_v7 = vld [vmem:[#allocation3 + $0x90] sm:$0xff] }
 0x1f8   : > { %1750 = vst.msk [vmem:[#allocation3 + $0x98] sm:$0xff] %vm275_vm0, %v1702_v46  ;;  %v1991_v15 = vadd.f32 %v1943_v7, %v1850_v43  ;;  %v1620_v20 = vpop.f32.mrf.mxu3 }
 0x1f9   : > { %v1725_v56 = vadd.f32 %v1677_v53, %v1620_v20 }
 0x1fa   : > { %2039 = vst.msk [vmem:[#allocation3 + $0x90] sm:$0xff] %vm275_vm0, %v1991_v15  ;;  %v1237_v9 = vpop.f32.mrf.mxu0 }
 0x1fb   : > { %1773 = vst.msk [vmem:[#allocation3 + $0x150] sm:$0xff] %vm275_vm0, %v1725_v56 }
 0x1fc   : > { %1323 = vst.msk [vmem:[#allocation3 + $0xb8] sm:$0xff] %vm275_vm0, %v1237_v9  ;;  %v1657_v12 = vld [vmem:[#allocation3 + $0xb0] sm:$0xff] }
 0x1fd   : > { %v1565_v61 = vpop.f32.mrf.mxu1 }
 0x1fe   : > { %v1703_v63 = vadd.f32 %v1655_v29, %v1565_v61 }
 0x1ff   : > { %v1852_v11 = vpop.f32.mrf.mxu2  ;;  %v1944_v50 = vld [vmem:[#allocation3 + $0x98] sm:$0xff] }
 0x200   : > { %1751 = vst.msk [vmem:[#allocation3 + $0xa0] sm:$0xff] %vm275_vm0, %v1703_v63  ;;  %v1992_v49 = vadd.f32 %v1944_v50, %v1852_v11  ;;  %v1622_v34 = vpop.f32.mrf.mxu3  ;;  %v1682_v50 = vld [vmem:[#allocation3 + $0x178] sm:$0xff] }
 0x201   : > { %v2081_v35 = vld [vmem:[#allocation3 + $0x90] sm:$0xff]  ;;  %v1726_v21 = vadd.f32 %v1678_v54, %v1622_v34 }
 0x202   : > { %v2113_v39 = vpack.c.bf16 %v2081_v35, %v2081_v35  ;;  %v2189_v31 = vsel %vm275_vm0, %v2081_v35, 0.0  ;;  %v2247_v36 = vmul.f32 %v2081_v35, %v2081_v35  ;;  %2040 = vst.msk [vmem:[#allocation3 + $0x98] sm:$0xff] %vm275_vm0, %v1992_v49  ;;  %v1240_v62 = vpop.f32.mrf.mxu0 }
 0x203   : > { %v2190_v45 = vadd.f32 %v2189_v31, %v2188_v8  ;;  %1774 = vst.msk [vmem:[#allocation3 + $0x158] sm:$0xff] %vm275_vm0, %v1726_v21  ;;  %v1658_v52 = vld [vmem:[#allocation3 + $0xb8] sm:$0xff]  ;;  %v1681_v8 = vld [vmem:[#allocation3 + $0x170] sm:$0xff] }
 0x204   : > { %2146 = vst.msk [vmem:[%s3553_s6 + $0x30] sm:$0xf] %vm2133_vm7, %v2113_v39  ;;  %v2290_v48 = vsel %vm275_vm0, %v2247_v36, 0.0 }
 0x205   : > { %v2291_v42 = vadd.f32 %v2290_v48, %v2289_v13  ;;  %v1567_v60 = vpop.f32.mrf.mxu1  ;;  %1324 = vst.msk [vmem:[#allocation3 + $0xc0] sm:$0xff] %vm275_vm0, %v1240_v62 }
 0x206   : > { %v1704_v10 = vadd.f32 %v1656_v41, %v1567_v60 }
 0x207   : > { %v1855_v27 = vpop.f32.mrf.mxu2  ;;  %v1945_v28 = vld [vmem:[#allocation3 + $0xa0] sm:$0xff] }
 0x208   : > { %1752 = vst.msk [vmem:[#allocation3 + $0xa8] sm:$0xff] %vm275_vm0, %v1704_v10  ;;  %v1993_v44 = vadd.f32 %v1945_v28, %v1855_v27  ;;  %v1625_v59 = vpop.f32.mrf.mxu3  ;;  %v1961_v28 = vld [vmem:[#allocation3 + $0x120] sm:$0xff] }
 0x209   : > { %v2082_v37 = vld [vmem:[#allocation3 + $0x98] sm:$0xff]  ;;  %v1727_v25 = vadd.f32 %v1679_v18, %v1625_v59 }
 0x20a   : > { %v2114_v55 = vpack.c.bf16 %v2082_v37, %v2082_v37  ;;  %v2191_v16 = vsel %vm275_vm0, %v2082_v37, 0.0  ;;  %v2248_v1 = vmul.f32 %v2082_v37, %v2082_v37  ;;  %2041 = vst.msk [vmem:[#allocation3 + $0xa0] sm:$0xff] %vm275_vm0, %v1993_v44  ;;  %v1242_v17 = vpop.f32.mrf.mxu0 }
 0x20b   : > { %v2192_v38 = vadd.f32 %v2191_v16, %v2190_v45  ;;  %1775 = vst.msk [vmem:[#allocation3 + $0x160] sm:$0xff] %vm275_vm0, %v1727_v25 }
 0x20c   : > { %2147 = vst.msk [vmem:[%s3553_s6 + $0x34] sm:$0xf] %vm2133_vm7, %v2114_v55  ;;  %v2292_v26 = vsel %vm275_vm0, %v2248_v1, 0.0  ;;  %v1659_v15 = vld [vmem:[#allocation3 + $0xc0] sm:$0xff] }
 0x20d   : > { %v2293_v14 = vadd.f32 %v2292_v26, %v2291_v42  ;;  %v1570_v32 = vpop.f32.mrf.mxu1  ;;  %1325 = vst.msk [vmem:[#allocation3 + $0xc8] sm:$0xff] %vm275_vm0, %v1242_v17 }
 0x20e   : > { %v1705_v5 = vadd.f32 %v1657_v12, %v1570_v32 }
 0x20f   : > { %v1857_v2 = vpop.f32.mrf.mxu2  ;;  %v1946_v30 = vld [vmem:[#allocation3 + $0xa8] sm:$0xff] }
 0x210   : > { %1753 = vst.msk [vmem:[#allocation3 + $0xb0] sm:$0xff] %vm275_vm0, %v1705_v5  ;;  %v1994_v22 = vadd.f32 %v1946_v30, %v1857_v2  ;;  %v1627_v33 = vpop.f32.mrf.mxu3 }
 0x211   : > { %v1728_v0 = vadd.f32 %v1680_v40, %v1627_v33 }
 0x212   : > { %2042 = vst.msk [vmem:[#allocation3 + $0xa8] sm:$0xff] %vm275_vm0, %v1994_v22  ;;  %v1245_v51 = vpop.f32.mrf.mxu0 }
 0x213   : > { %1776 = vst.msk [vmem:[#allocation3 + $0x168] sm:$0xff] %vm275_vm0, %v1728_v0 }
 0x214   : > { %1326 = vst.msk [vmem:[#allocation3 + $0xd0] sm:$0xff] %vm275_vm0, %v1245_v51  ;;  %v1660_v36 = vld [vmem:[#allocation3 + $0xc8] sm:$0xff] }
 0x215   : > { %v1572_v3 = vpop.f32.mrf.mxu1 }
 0x216   : > { %v1706_v58 = vadd.f32 %v1658_v52, %v1572_v3 }
 0x217   : > { %v1860_v6 = vpop.f32.mrf.mxu2  ;;  %v1947_v47 = vld [vmem:[#allocation3 + $0xb0] sm:$0xff] }
 0x218   : > { %1754 = vst.msk [vmem:[#allocation3 + $0xb8] sm:$0xff] %vm275_vm0, %v1706_v58  ;;  %v1995_v23 = vadd.f32 %v1947_v47, %v1860_v6  ;;  %v1630_v4 = vpop.f32.mrf.mxu3 }
 0x219   : > { %v2083_v24 = vld [vmem:[#allocation3 + $0xa8] sm:$0xff]  ;;  %v1729_v19 = vadd.f32 %v1681_v8, %v1630_v4  ;;  %v1963_v4 = vld [vmem:[#allocation3 + $0x130] sm:$0xff] }
 0x21a   : > { %v2115_v13 = vpack.c.bf16 %v2083_v24, %v2083_v24  ;;  %v2193_v57 = vsel %vm275_vm0, %v2083_v24, 0.0  ;;  %v2249_v46 = vmul.f32 %v2083_v24, %v2083_v24  ;;  %2043 = vst.msk [vmem:[#allocation3 + $0xb0] sm:$0xff] %vm275_vm0, %v1995_v23  ;;  %v1247_v43 = vpop.f32.mrf.mxu0 }
 0x21b   : > { %v2194_v7 = vadd.f32 %v2193_v57, %v2192_v38  ;;  %1777 = vst.msk [vmem:[#allocation3 + $0x170] sm:$0xff] %vm275_vm0, %v1729_v19  ;;  %v1661_v18 = vld [vmem:[#allocation3 + $0xd0] sm:$0xff]  ;;  %v1962_v38 = vld [vmem:[#allocation3 + $0x128] sm:$0xff] }
 0x21c   : > { %2148 = vst.msk [vmem:[%s3553_s6 + $0x38] sm:$0xf] %vm2133_vm7, %v2115_v13  ;;  %v2294_v20 = vsel %vm275_vm0, %v2249_v46, 0.0 }
 0x21d   : > { %v2295_v53 = vadd.f32 %v2294_v20, %v2293_v14  ;;  %v1575_v56 = vpop.f32.mrf.mxu1  ;;  %1327 = vst.msk [vmem:[#allocation3 + $0xd8] sm:$0xff] %vm275_vm0, %v1247_v43 }
 0x21e   : > { %v1707_v9 = vadd.f32 %v1659_v15, %v1575_v56 }
 0x21f   : > { %v1862_v29 = vpop.f32.mrf.mxu2  ;;  %v1948_v61 = vld [vmem:[#allocation3 + $0xb8] sm:$0xff] }
 0x220   : > { %1755 = vst.msk [vmem:[#allocation3 + $0xc0] sm:$0xff] %vm275_vm0, %v1707_v9  ;;  %v1996_v63 = vadd.f32 %v1948_v61, %v1862_v29  ;;  %v1632_v11 = vpop.f32.mrf.mxu3  ;;  %v1964_v29 = vld [vmem:[#allocation3 + $0x138] sm:$0xff] }
 0x221   : > { %v2084_v49 = vld [vmem:[#allocation3 + $0xb0] sm:$0xff]  ;;  %v1730_v34 = vadd.f32 %v1682_v50, %v1632_v11 }
 0x222   : > { %v2116_v54 = vpack.c.bf16 %v2084_v49, %v2084_v49  ;;  %v2195_v35 = vsel %vm275_vm0, %v2084_v49, 0.0  ;;  %v2250_v21 = vmul.f32 %v2084_v49, %v2084_v49  ;;  %2044 = vst.msk [vmem:[#allocation3 + $0xb8] sm:$0xff] %vm275_vm0, %v1996_v63  ;;  %v1250_v39 = vpop.f32.mrf.mxu0 }
 0x223   : > { %v2196_v31 = vadd.f32 %v2195_v35, %v2194_v7  ;;  %1778 = vst.msk [vmem:[#allocation3 + $0x178] sm:$0xff] %vm275_vm0, %v1730_v34 }
 0x224   : > { %2149 = vst.msk [vmem:[%s3553_s6 + $0x3c] sm:$0xf] %vm2133_vm7, %v2116_v54  ;;  %v2296_v62 = vsel %vm275_vm0, %v2250_v21, 0.0  ;;  %v1662_v40 = vld [vmem:[#allocation3 + $0xd8] sm:$0xff] }
 0x225   : > { %v2297_v45 = vadd.f32 %v2296_v62, %v2295_v53  ;;  %v1577_v41 = vpop.f32.mrf.mxu1  ;;  %1328 = vst.msk [vmem:[#allocation3 + $0xe0] sm:$0xff] %vm275_vm0, %v1250_v39  ;;  %v1965_v39 = vld [vmem:[#allocation3 + $0x140] sm:$0xff] }
 0x226   : > { %v1708_v48 = vadd.f32 %v1660_v36, %v1577_v41 }
 0x227   : > { %v1865_v42 = vpop.f32.mrf.mxu2  ;;  %v1949_v60 = vld [vmem:[#allocation3 + $0xc0] sm:$0xff] }
 0x228   : > { %1756 = vst.msk [vmem:[#allocation3 + $0xc8] sm:$0xff] %vm275_vm0, %v1708_v48  ;;  %v1997_v10 = vadd.f32 %v1949_v60, %v1865_v42  ;;  %v1895_v27 = vpop.f32.mrf.mxu3 }
 0x229   : > { %v2009_v44 = vadd.f32 %v1961_v28, %v1895_v27 }
 0x22a   : > { %2045 = vst.msk [vmem:[#allocation3 + $0xc0] sm:$0xff] %vm275_vm0, %v1997_v10  ;;  %v1252_v59 = vpop.f32.mrf.mxu0 }
 0x22b   : > { %2057 = vst.msk [vmem:[#allocation3 + $0x120] sm:$0xff] %vm275_vm0, %v2009_v44 }
 0x22c   : > { %1329 = vst.msk [vmem:[#allocation3 + $0xe8] sm:$0xff] %vm275_vm0, %v1252_v59  ;;  %v1663_v46 = vld [vmem:[#allocation3 + $0xe0] sm:$0xff] }
 0x22d   : > { %v1580_v37 = vpop.f32.mrf.mxu1 }
 0x22e   : > { %v1709_v25 = vadd.f32 %v1661_v18, %v1580_v37  ;;  %v1966_v18 = vld [vmem:[#allocation3 + $0x148] sm:$0xff] }
 0x22f   : > { %v1867_v55 = vpop.f32.mrf.mxu2  ;;  %v1950_v16 = vld [vmem:[#allocation3 + $0xc8] sm:$0xff] }
 0x230   : > { %1757 = vst.msk [vmem:[#allocation3 + $0xd0] sm:$0xff] %vm275_vm0, %v1709_v25  ;;  %v1998_v1 = vadd.f32 %v1950_v16, %v1867_v55  ;;  %v1897_v17 = vpop.f32.mrf.mxu3 }
 0x231   : > { %v2085_v12 = vld [vmem:[#allocation3 + $0xc0] sm:$0xff]  ;;  %v2010_v26 = vadd.f32 %v1962_v38, %v1897_v17 }
 0x232   : > { %v2117_v14 = vpack.c.bf16 %v2085_v12, %v2085_v12  ;;  %v2197_v32 = vsel %vm275_vm0, %v2085_v12, 0.0  ;;  %v2251_v5 = vmul.f32 %v2085_v12, %v2085_v12  ;;  %v3851_v2 = vld [vmem:[#allocation3 + $0x120] sm:$0xff]  ;;  %2046 = vst.msk [vmem:[#allocation3 + $0xc8] sm:$0xff] %vm275_vm0, %v1998_v1  ;;  %v1255_v30 = vpop.f32.mrf.mxu0 }
 0x233   : > { %v3854_v22 = vadd.f32 %v2197_v32, %v2196_v31  ;;  %v2125_v33 = vpack.c.bf16 %v3851_v2, %v3851_v2  ;;  %2058 = vst.msk [vmem:[#allocation3 + $0x128] sm:$0xff] %vm275_vm0, %v2010_v26  ;;  %v1664_v11 = vld [vmem:[#allocation3 + $0xe8] sm:$0xff] }
 0x234   : > { %2150 = vst.msk [vmem:[%s3553_s6 + $0x40] sm:$0xf] %vm2133_vm7, %v2117_v14  ;;  %v2298_v0 = vsel %vm275_vm0, %v2251_v5, 0.0 }
 0x235   : > { %v3862_v51 = vadd.f32 %v2298_v0, %v2297_v45  ;;  %2158 = vst.msk [vmem:[%s3553_s6 + $0x60] sm:$0xf] %vm2133_vm7, %v2125_v33  ;;  %v1582_v52 = vpop.f32.mrf.mxu1  ;;  %v1967_v33 = vld [vmem:[#allocation3 + $0x150] sm:$0xff] }
 0x236   : > { %v1710_v3 = vadd.f32 %v1662_v40, %v1582_v52  ;;  %1330 = vst.msk [vmem:[#allocation3 + $0xf0] sm:$0xff] %vm275_vm0, %v1255_v30 }
 0x237   : > { %v1870_v58 = vpop.f32.mrf.mxu2  ;;  %v1951_v6 = vld [vmem:[#allocation3 + $0xd0] sm:$0xff] }
 0x238   : > { %1758 = vst.msk [vmem:[#allocation3 + $0xd8] sm:$0xff] %vm275_vm0, %v1710_v3  ;;  %v1999_v47 = vadd.f32 %v1951_v6, %v1870_v58  ;;  %v1900_v23 = vpop.f32.mrf.mxu3 }
 0x239   : > { %v3868_v8 = vld [vmem:[#allocation3 + $0xc8] sm:$0xff]  ;;  %v2011_v24 = vadd.f32 %v1963_v4, %v1900_v23 }
 0x23a   : > { %v2118_v19 = vpack.c.bf16 %v3868_v8, %v3868_v8  ;;  %2047 = vst.msk [vmem:[#allocation3 + $0xd0] sm:$0xff] %vm275_vm0, %v1999_v47  ;;  %v1257_v13 = vpop.f32.mrf.mxu0  ;;  %v3873_v57 = vld [vmem:[#allocation3 + $0x128] sm:$0xff] }
 0x23b   : > { %2059 = vst.msk [vmem:[#allocation3 + $0x130] sm:$0xff] %vm275_vm0, %v2011_v24  ;;  %v2126_v43 = vpack.c.bf16 %v3873_v57, %v3873_v57  ;;  %v1968_v24 = vld [vmem:[#allocation3 + $0x158] sm:$0xff] }
 0x23c   : > { %2151 = vst.msk [vmem:[%s3553_s6 + $0x44] sm:$0xf] %vm2133_vm7, %v2118_v19 }
 0x23d   : > { %v1585_v7 = vpop.f32.mrf.mxu1  ;;  %1331 = vst.msk [vmem:[#allocation3 + $0xf8] sm:$0xff] %vm275_vm0, %v1257_v13  ;;  %v1665_v48 = vld [vmem:[#allocation3 + $0xf0] sm:$0xff] }
 0x23e   : > { %v1711_v15 = vadd.f32 %v1663_v46, %v1585_v7  ;;  %2159 = vst.msk [vmem:[%s3553_s6 + $0x64] sm:$0xf] %vm2133_vm7, %v2126_v43 }
 0x23f   : > { %v1872_v20 = vpop.f32.mrf.mxu2  ;;  %v1952_v53 = vld [vmem:[#allocation3 + $0xd8] sm:$0xff] }
 0x240   : > { %1759 = vst.msk [vmem:[#allocation3 + $0xe0] sm:$0xff] %vm275_vm0, %v1711_v15  ;;  %v2000_v56 = vadd.f32 %v1952_v53, %v1872_v20  ;;  %v1902_v9 = vpop.f32.mrf.mxu3  ;;  %v2792_v53 = vmov 0.0  }
 0x241   : > { %v2012_v61 = vadd.f32 %v1964_v29, %v1902_v9  ;;  %334 = vst.msk [vmem:[%s3939_s5] sm:$0x3] %vm333_vm8, %v2792_v53 }
 0x242   : > { %2048 = vst.msk [vmem:[#allocation3 + $0xd8] sm:$0xff] %vm275_vm0, %v2000_v56  ;;  %v1260_v63 = vpop.f32.mrf.mxu0 }
 0x243   : > { %2060 = vst.msk [vmem:[#allocation3 + $0x138] sm:$0xff] %vm275_vm0, %v2012_v61 }
 0x244   : > { %1332 = vst.msk [vmem:[#allocation3 + $0x100] sm:$0xff] %vm275_vm0, %v1260_v63  ;;  %v1666_v17 = vld [vmem:[#allocation3 + $0xf8] sm:$0xff] }
 0x245   : > { %v1587_v50 = vpop.f32.mrf.mxu1 }
 0x246   : > { %v1712_v49 = vadd.f32 %v1664_v11, %v1587_v50  ;;  %v1969_v11 = vld [vmem:[#allocation3 + $0x160] sm:$0xff] }
 0x247   : > { %v1875_v34 = vpop.f32.mrf.mxu2  ;;  %v1953_v54 = vld [vmem:[#allocation3 + $0xe0] sm:$0xff] }
 0x248   : > { %1760 = vst.msk [vmem:[#allocation3 + $0xe8] sm:$0xff] %vm275_vm0, %v1712_v49  ;;  %v2001_v35 = vadd.f32 %v1953_v54, %v1875_v34  ;;  %v1905_v21 = vpop.f32.mrf.mxu3 }
 0x249   : > { %v3888_v31 = vld [vmem:[#allocation3 + $0xd8] sm:$0xff]  ;;  %v2013_v36 = vadd.f32 %v1965_v39, %v1905_v21 }
 0x24a   : > { %v2119_v62 = vpack.c.bf16 %v3888_v31, %v3888_v31  ;;  %2049 = vst.msk [vmem:[#allocation3 + $0xe0] sm:$0xff] %vm275_vm0, %v2001_v35  ;;  %v1262_v45 = vpop.f32.mrf.mxu0  ;;  %v3893_v41 = vld [vmem:[#allocation3 + $0x138] sm:$0xff] }
 0x24b   : > { %2061 = vst.msk [vmem:[#allocation3 + $0x140] sm:$0xff] %vm275_vm0, %v2013_v36  ;;  %v2127_v42 = vpack.c.bf16 %v3893_v41, %v3893_v41  ;;  %v1667_v52 = vld [vmem:[#allocation3 + $0x100] sm:$0xff] }
 0x24c   : > { %2152 = vst.msk [vmem:[%s3553_s6 + $0x48] sm:$0xf] %vm2133_vm7, %v2119_v62 }
 0x24d   : > { %v1590_v60 = vpop.f32.mrf.mxu1  ;;  %1333 = vst.msk [vmem:[#allocation3 + $0x108] sm:$0xff] %vm275_vm0, %v1262_v45 }
 0x24e   : > { %v1713_v10 = vadd.f32 %v1665_v48, %v1590_v60  ;;  %2160 = vst.msk [vmem:[%s3553_s6 + $0x68] sm:$0xf] %vm2133_vm7, %v2127_v42  ;;  %v1970_v60 = vld [vmem:[#allocation3 + $0x168] sm:$0xff] }
 0x24f   : > { %v1877_v27 = vpop.f32.mrf.mxu2  ;;  %v1954_v28 = vld [vmem:[#allocation3 + $0xe8] sm:$0xff] }
 0x250   : > { %1761 = vst.msk [vmem:[#allocation3 + $0xf0] sm:$0xff] %vm275_vm0, %v1713_v10  ;;  %v2002_v44 = vadd.f32 %v1954_v28, %v1877_v27  ;;  %v1907_v59 = vpop.f32.mrf.mxu3  ;;  %v2252_v27 = vmul.f32 %v3868_v8, %v3868_v8 }
 0x251   : > { %v3904_v37 = vld [vmem:[#allocation3 + $0xe0] sm:$0xff]  ;;  %v2014_v25 = vadd.f32 %v1966_v18, %v1907_v59  ;;  %v2253_v59 = vmul.f32 %v3888_v31, %v3888_v31 }
 0x252   : > { %v2120_v55 = vpack.c.bf16 %v3904_v37, %v3904_v37  ;;  %2050 = vst.msk [vmem:[#allocation3 + $0xe8] sm:$0xff] %vm275_vm0, %v2002_v44  ;;  %v1265_v16 = vpop.f32.mrf.mxu0  ;;  %v3909_v1 = vld [vmem:[#allocation3 + $0x140] sm:$0xff]  ;;  %v2199_v44 = vsel %vm275_vm0, %v3868_v8, 0.0  ;;  %v2203_v8 = vsel %vm275_vm0, %v3904_v37, 0.0 }
 0x253   : > { %2062 = vst.msk [vmem:[#allocation3 + $0x148] sm:$0xff] %vm275_vm0, %v2014_v25  ;;  %v2128_v38 = vpack.c.bf16 %v3909_v1, %v3909_v1  ;;  %v2300_v25 = vsel %vm275_vm0, %v2252_v27, 0.0  ;;  %v2260_v27 = vmul.f32 %v3873_v57, %v3873_v57 }
 0x254   : > { %2153 = vst.msk [vmem:[%s3553_s6 + $0x4c] sm:$0xf] %vm2133_vm7, %v2120_v55  ;;  %v1668_v7 = vld [vmem:[#allocation3 + $0x108] sm:$0xff]  ;;  %v2201_v55 = vsel %vm275_vm0, %v3888_v31, 0.0 }
 0x255   : > { %v1592_v12 = vpop.f32.mrf.mxu1  ;;  %1334 = vst.msk [vmem:[#allocation3 + $0x110] sm:$0xff] %vm275_vm0, %v1265_v16  ;;  %v2254_v16 = vmul.f32 %v3904_v37, %v3904_v37 }
 0x256   : > { %v1714_v26 = vadd.f32 %v1666_v17, %v1592_v12  ;;  %2161 = vst.msk [vmem:[%s3553_s6 + $0x6c] sm:$0xf] %vm2133_vm7, %v2128_v38  ;;  %v2200_v38 = vadd.f32 %v2199_v44, %v3854_v22 }
 0x257   : > { %v1880_v14 = vpop.f32.mrf.mxu2  ;;  %v1955_v32 = vld [vmem:[#allocation3 + $0xf0] sm:$0xff] }
 0x258   : > { %1762 = vst.msk [vmem:[#allocation3 + $0xf8] sm:$0xff] %vm275_vm0, %v1714_v26  ;;  %v2003_v5 = vadd.f32 %v1955_v32, %v1880_v14  ;;  %v1910_v30 = vpop.f32.mrf.mxu3  ;;  %v2302_v14 = vsel %vm275_vm0, %v2253_v59, 0.0 }
 0x259   : > { %v2015_v40 = vadd.f32 %v1967_v33, %v1910_v30  ;;  %v1971_v30 = vld [vmem:[#allocation3 + $0x170] sm:$0xff]  ;;  %v2301_v33 = vadd.f32 %v2300_v25, %v3862_v51  ;;  %v2261_v25 = vmul.f32 %v3893_v41, %v3893_v41 }
 0x25a   : > { %2051 = vst.msk [vmem:[#allocation3 + $0xf0] sm:$0xff] %vm275_vm0, %v2003_v5  ;;  %v1267_v0 = vpop.f32.mrf.mxu0 }
 0x25b   : > { %2063 = vst.msk [vmem:[#allocation3 + $0x150] sm:$0xff] %vm275_vm0, %v2015_v40  ;;  %v2202_v40 = vadd.f32 %v2201_v55, %v2200_v38  ;;  %v2262_v38 = vmul.f32 %v3909_v1, %v3909_v1 }
 0x25c   : > { %1335 = vst.msk [vmem:[#allocation3 + $0x118] sm:$0xff] %vm275_vm0, %v1267_v0  ;;  %v1669_v35 = vld [vmem:[#allocation3 + $0x110] sm:$0xff] }
 0x25d   : > { %v1595_v3 = vpop.f32.mrf.mxu1 }
 0x25e   : > { %v1715_v58 = vadd.f32 %v1667_v52, %v1595_v3  ;;  %v2304_v52 = vsel %vm275_vm0, %v2254_v16, 0.0 }
 0x25f   : > { %v1882_v6 = vpop.f32.mrf.mxu2  ;;  %v1956_v47 = vld [vmem:[#allocation3 + $0xf8] sm:$0xff] }
 0x260   : > { %1763 = vst.msk [vmem:[#allocation3 + $0x100] sm:$0xff] %vm275_vm0, %v1715_v58  ;;  %v2004_v23 = vadd.f32 %v1956_v47, %v1882_v6  ;;  %v1912_v4 = vpop.f32.mrf.mxu3  ;;  %v2303_v47 = vadd.f32 %v2302_v14, %v2301_v33  ;;  %v2320_v33 = vsel %vm275_vm0, %v2262_v38, 0.0 }
 0x261   : > { %v3927_v19 = vld [vmem:[#allocation3 + $0xf0] sm:$0xff]  ;;  %v2016_v13 = vadd.f32 %v1968_v24, %v1912_v4 }
 0x262   : > { %v2121_v46 = vpack.c.bf16 %v3927_v19, %v3927_v19  ;;  %2052 = vst.msk [vmem:[#allocation3 + $0xf8] sm:$0xff] %vm275_vm0, %v2004_v23  ;;  %v3932_v43 = vld [vmem:[#allocation3 + $0x150] sm:$0xff]  ;;  %v2255_v32 = vmul.f32 %v3927_v19, %v3927_v19  ;;  %v2205_v37 = vsel %vm275_vm0, %v3927_v19, 0.0  ;;  %v2204_v23 = vadd.f32 %v2203_v8, %v2202_v40 }
 0x263   : > { %2064 = vst.msk [vmem:[#allocation3 + $0x158] sm:$0xff] %vm275_vm0, %v2016_v13  ;;  %v2129_v15 = vpack.c.bf16 %v3932_v43, %v3932_v43  ;;  %v1670_v28 = vld [vmem:[#allocation3 + $0x118] sm:$0xff]  ;;  %v2305_v13 = vadd.f32 %v2304_v52, %v2303_v47  ;;  %v2263_v8 = vmul.f32 %v3932_v43, %v3932_v43 }
 0x264   : > { %2154 = vst.msk [vmem:[%s3553_s6 + $0x50] sm:$0xf] %vm2133_vm7, %v2121_v46  ;;  %v2306_v4 = vsel %vm275_vm0, %v2255_v32, 0.0  ;;  %v2206_v46 = vadd.f32 %v2205_v37, %v2204_v23  ;;  %v2318_v32 = vsel %vm275_vm0, %v2261_v25, 0.0 }
 0x265   : > { %v1597_v20 = vpop.f32.mrf.mxu1  ;;  %2162 = vst.msk [vmem:[%s3553_s6 + $0x70] sm:$0xf] %vm2133_vm7, %v2129_v15  ;;  %v2322_v52 = vsel %vm275_vm0, %v2263_v8, 0.0 }
 0x266   : > { %v1716_v56 = vadd.f32 %v1668_v7, %v1597_v20  ;;  %v2307_v20 = vadd.f32 %v2306_v4, %v2305_v13 }
 0x267   : > { %v1885_v9 = vpop.f32.mrf.mxu2  ;;  %v1957_v29 = vld [vmem:[#allocation3 + $0x100] sm:$0xff] }
 0x268   : > { %1764 = vst.msk [vmem:[#allocation3 + $0x108] sm:$0xff] %vm275_vm0, %v1716_v56  ;;  %v2005_v61 = vadd.f32 %v1957_v29, %v1885_v9  ;;  %v1915_v63 = vpop.f32.mrf.mxu3 }
 0x269   : > { %v2090_v50 = vld [vmem:[#allocation3 + $0xf8] sm:$0xff]  ;;  %v2017_v49 = vadd.f32 %v1969_v11, %v1915_v63 }
 0x26a   : > { %v2122_v34 = vpack.c.bf16 %v2090_v50, %v2090_v50  ;;  %2053 = vst.msk [vmem:[#allocation3 + $0x100] sm:$0xff] %vm275_vm0, %v2005_v61  ;;  %v3947_v54 = vld [vmem:[#allocation3 + $0x158] sm:$0xff]  ;;  %v2256_v3 = vmul.f32 %v2090_v50, %v2090_v50  ;;  %v2207_v24 = vsel %vm275_vm0, %v2090_v50, 0.0 }
 0x26b   : > { %2065 = vst.msk [vmem:[#allocation3 + $0x160] sm:$0xff] %vm275_vm0, %v2017_v49  ;;  %v2130_v21 = vpack.c.bf16 %v3947_v54, %v3947_v54  ;;  %v2208_v53 = vadd.f32 %v2207_v24, %v2206_v46  ;;  %v1972_v63 = vld [vmem:[#allocation3 + $0x178] sm:$0xff] }
 0x26c   : > { %2155 = vst.msk [vmem:[%s3553_s6 + $0x54] sm:$0xf] %vm2133_vm7, %v2122_v34  ;;  %v2308_v7 = vsel %vm275_vm0, %v2256_v3, 0.0 }
 0x26d   : > { %v1600_v39 = vpop.f32.mrf.mxu1  ;;  %2163 = vst.msk [vmem:[%s3553_s6 + $0x74] sm:$0xf] %vm2133_vm7, %v2130_v21 }
 0x26e   : > { %v1717_v36 = vadd.f32 %v1669_v35, %v1600_v39  ;;  %v2309_v35 = vadd.f32 %v2308_v7, %v2307_v20 }
 0x26f   : > { %v1887_v62 = vpop.f32.mrf.mxu2  ;;  %v1958_v45 = vld [vmem:[#allocation3 + $0x108] sm:$0xff] }
 0x270   : > { %1765 = vst.msk [vmem:[#allocation3 + $0x110] sm:$0xff] %vm275_vm0, %v1717_v36  ;;  %v2006_v48 = vadd.f32 %v1958_v45, %v1887_v62  ;;  %v1917_v42 = vpop.f32.mrf.mxu3  ;;  %v2259_v45 = vmul.f32 %v3851_v2, %v3851_v2 }
 0x271   : > { %v2018_v10 = vadd.f32 %v1970_v60, %v1917_v42 }
 0x272   : > { %2054 = vst.msk [vmem:[#allocation3 + $0x108] sm:$0xff] %vm275_vm0, %v2006_v48  ;;  %v2314_v55 = vsel %vm275_vm0, %v2259_v45, 0.0 }
 0x273   : > { %2066 = vst.msk [vmem:[#allocation3 + $0x168] sm:$0xff] %vm275_vm0, %v2018_v10  ;;  %v2213_v10 = vsel %vm275_vm0, %v3851_v2, 0.0  ;;  %v2217_v2 = vsel %vm275_vm0, %v3893_v41, 0.0  ;;  %v2221_v41 = vsel %vm275_vm0, %v3932_v43, 0.0 }
 0x275   : > { %v1602_v18 = vpop.f32.mrf.mxu1 }
 0x276   : > { %v1718_v17 = vadd.f32 %v1670_v28, %v1602_v18  ;;  %v2215_v18 = vsel %vm275_vm0, %v3873_v57, 0.0  ;;  %v2219_v57 = vsel %vm275_vm0, %v3909_v1, 0.0  ;;  %v2223_v1 = vsel %vm275_vm0, %v3947_v54, 0.0 }
 0x277   : > { %v1890_v12 = vpop.f32.mrf.mxu2  ;;  %v1959_v26 = vld [vmem:[#allocation3 + $0x110] sm:$0xff] }
 0x278   : > { %1766 = vst.msk [vmem:[#allocation3 + $0x118] sm:$0xff] %vm275_vm0, %v1718_v17  ;;  %v2007_v5 = vadd.f32 %v1959_v26, %v1890_v12  ;;  %v1920_v31 = vpop.f32.mrf.mxu3  ;;  %v2316_v12 = vsel %vm275_vm0, %v2260_v27, 0.0 }
 0x279   : > { %v2091_v22 = vld [vmem:[#allocation3 + $0x108] sm:$0xff]  ;;  %v2019_v0 = vadd.f32 %v1971_v30, %v1920_v31  ;;  %v2264_v30 = vmul.f32 %v3947_v54, %v3947_v54 }
 0x27a   : > { %v2123_v58 = vpack.c.bf16 %v2091_v22, %v2091_v22  ;;  %2055 = vst.msk [vmem:[#allocation3 + $0x110] sm:$0xff] %vm275_vm0, %v2007_v5  ;;  %v3982_v6 = vld [vmem:[#allocation3 + $0x168] sm:$0xff]  ;;  %v2257_v19 = vmul.f32 %v2091_v22, %v2091_v22  ;;  %v2209_v15 = vsel %vm275_vm0, %v2091_v22, 0.0 }
 0x27b   : > { %2067 = vst.msk [vmem:[#allocation3 + $0x170] sm:$0xff] %vm275_vm0, %v2019_v0  ;;  %v2131_v51 = vpack.c.bf16 %v3982_v6, %v3982_v6  ;;  %v2210_v34 = vadd.f32 %v2209_v15, %v2208_v53  ;;  %v2265_v0 = vmul.f32 %v3982_v6, %v3982_v6  ;;  %v2225_v43 = vsel %vm275_vm0, %v3982_v6, 0.0 }
 0x27c   : > { %2156 = vst.msk [vmem:[%s3553_s6 + $0x58] sm:$0xf] %vm2133_vm7, %v2123_v58  ;;  %v2310_v11 = vsel %vm275_vm0, %v2257_v19, 0.0  ;;  %v2324_v47 = vsel %vm275_vm0, %v2264_v30, 0.0 }
 0x27d   : > { %2164 = vst.msk [vmem:[%s3553_s6 + $0x78] sm:$0xf] %vm2133_vm7, %v2131_v51  ;;  %v2311_v60 = vadd.f32 %v2310_v11, %v2309_v35  ;;  %v2326_v54 = vsel %vm275_vm0, %v2265_v0, 0.0 }
 0x27f   : > { %v1892_v56 = vpop.f32.mrf.mxu2  ;;  %v1960_v9 = vld [vmem:[#allocation3 + $0x118] sm:$0xff] }
 0x280   : > { %v2008_v29 = vadd.f32 %v1960_v9, %v1892_v56  ;;  %v1922_v61 = vpop.f32.mrf.mxu3 }
 0x281   : > { %v2092_v50 = vld [vmem:[#allocation3 + $0x110] sm:$0xff]  ;;  %v2020_v49 = vadd.f32 %v1972_v63, %v1922_v61 }
 0x282   : > { %v2124_v21 = vpack.c.bf16 %v2092_v50, %v2092_v50  ;;  %v2258_v39 = vmul.f32 %v2092_v50, %v2092_v50  ;;  %2056 = vst.msk [vmem:[#allocation3 + $0x118] sm:$0xff] %vm275_vm0, %v2008_v29  ;;  %v2100_v36 = vld [vmem:[#allocation3 + $0x170] sm:$0xff]  ;;  %v2211_v62 = vsel %vm275_vm0, %v2092_v50, 0.0 }
 0x283   : > { %2068 = vst.msk [vmem:[#allocation3 + $0x178] sm:$0xff] %vm275_vm0, %v2020_v49  ;;  %v2132_v48 = vpack.c.bf16 %v2100_v36, %v2100_v36  ;;  %v2212_v42 = vadd.f32 %v2211_v62, %v2210_v34  ;;  %v2266_v58 = vmul.f32 %v2100_v36, %v2100_v36  ;;  %v2227_v4 = vsel %vm275_vm0, %v2100_v36, 0.0  ;;  %v2336_v49 = vld [vmem:[%s3939_s5] sm:$0x3] }
 0x284   : > { %2157 = vst.msk [vmem:[%s3553_s6 + $0x5c] sm:$0xf] %vm2133_vm7, %v2124_v21  ;;  %v2312_v28 = vsel %vm275_vm0, %v2258_v39, 0.0 }
 0x285   : > { %2165 = vst.msk [vmem:[%s3553_s6 + $0x7c] sm:$0xf] %vm2133_vm7, %v2132_v48  ;;  %v2214_v44 = vadd.f32 %v2213_v10, %v2212_v42  ;;  %v2313_v59 = vadd.f32 %v2312_v28, %v2311_v60  ;;  %v2328_v13 = vsel %vm275_vm0, %v2266_v58, 0.0 }
 0x287   : > { %v2216_v16 = vadd.f32 %v2215_v18, %v2214_v44  ;;  %v2315_v17 = vadd.f32 %v2314_v55, %v2313_v59 }
 0x289   : > { %v2218_v26 = vadd.f32 %v2217_v2, %v2216_v16  ;;  %v2317_v14 = vadd.f32 %v2316_v12, %v2315_v17 }
 0x28b   : > { %v2220_v5 = vadd.f32 %v2219_v57, %v2218_v26  ;;  %v2319_v31 = vadd.f32 %v2318_v32, %v2317_v14 }
 0x28d   : > { %v2222_v40 = vadd.f32 %v2221_v41, %v2220_v5  ;;  %v2321_v22 = vadd.f32 %v2320_v33, %v2319_v31 }
 0x28f   : > { %v2224_v37 = vadd.f32 %v2223_v1, %v2222_v40  ;;  %v2323_v3 = vadd.f32 %v2322_v52, %v2321_v22 }
 0x291   : > { %v2226_v23 = vadd.f32 %v2225_v43, %v2224_v37  ;;  %v2325_v51 = vadd.f32 %v2324_v47, %v2323_v3 }
 0x293   : > { %v2228_v24 = vadd.f32 %v2227_v4, %v2226_v23  ;;  %v2327_v19 = vadd.f32 %v2326_v54, %v2325_v51 }
 0x295   : > { %v2229_v46 = vrot.slane %v2228_v24, 4  ;;  %v2329_v7 = vadd.f32 %v2328_v13, %v2327_v19 }
 0x297   : > { %v2230_v15 = vadd.f32 %v2229_v46, %v2228_v24  ;;  %v2330_v6 = vrot.slane %v2329_v7, 4 }
 0x299   : > { %v2231_v20 = vrot.slane %v2230_v15, 2  ;;  %v2331_v53 = vadd.f32 %v2330_v6, %v2329_v7 }
 0x29b   : > { %v2232_v56 = vadd.f32 %v2231_v20, %v2230_v15  ;;  %v2332_v9 = vrot.slane %v2331_v53, 2 }
 0x29d   : > { %v2233_v29 = vrot.slane %v2232_v56, 1  ;;  %v2333_v61 = vadd.f32 %v2332_v9, %v2331_v53 }
 0x29f   : > { %v2334_v63 = vrot.slane %v2333_v61, 1  ;;  %v2234_v11 = vadd.f32 %v2233_v29, %v2232_v56 }
 0x2a1   : > { %v2335_v50 = vadd.f32 %v2334_v63, %v2333_v61 }
 0x2a3   : > { %v2338_v34 = vsel %vm2337_vm9, %v2234_v11, %v2335_v50 }
 0x2a4   : > { %v2339_v35 = vadd.f32 %v2338_v34, %v2336_v49 }
 0x2a6   : > { %2341 = vst.msk [vmem:[%s3939_s5] sm:$0x3] %vm333_vm8, %v2339_v35 }
 0x2a7   : > { %2736 = shalt.err (!%p2733_p5)
}
 0x2a8   : > { %2650 = dma.vmem_to_hbm [thread:$0]  (%p2853_p4), %s2366_s11, 32, %s2368_s18, %s2349_s15  }
 0x2a9 PF: > { %p2656_p6 = scmp.ge.s32.totalorder %s2787_s17, 2  ;;  %s2388_s6 = sand.u32 1, %s2767_s12  }
 0x2aa   : > { %s2389_s26 = scalar_lea.sflag [#allocation5], %s2388_s6 }
 0x2ab   : > { %p2653_p7 = pnand %p2656_p6, %p2860_p8 }
 0x2ad   : > { %p2654_p9 = pneg %p2653_p7 }
 0x2af   : > { %2762 = dma.done.wait (%p2654_p9), %s2389_s26, 32  }
 0x2b0   : > { %2764 = vsyncadd (%p2654_p9), %s2389_s26, 4294967264  ;;  %s17_s17 = sadd.s32 1, %s2787_s17   ;;  %s4089_s12 = smov %s2771_s13 }
 0x2b1   : > { %p14_p10 = scmp.ge.s32.totalorder %s17_s17, 4   ;;  %s4090_s13 = smov %s2775_s14 }
 0x2b2   : > { %s4091_s14 = smov %s2866_s25  ;;  %s4092_s15 = smov %s2783_s16 }
 0x2b3   : > { %s4093_s16 = smov %s4095_s20  ;;  %16 = sbr.rel (!%p14_p10) target bundleno = 4 (0x4), region = 82 }
 0x2b8   :  { %2395 = vsyncpa [#allocation5], 1 }
 0x2b9   :  { %2397 = vsyncpa [#allocation5 + $0x1], 1 }

</bundles_post_ra>
